<compile_context>
chip_gen: v6e
topology: v6e:2x2x1
jax: 0.10.0
libtpu: 0.0.40
codegen_flags: <defaults>
</compile_context>

<pallas_src>
import math
import jax
import jax.numpy as jnp
from jax.experimental import pallas as pl
from jax.experimental.pallas import tpu as pltpu

# ----------------------------- model hyper-parameters -----------------------------
B = 2          # batch
T = 8          # sequence length (qlen = klen, mems empty on first call)
D_MODEL = 32
N_HEAD = 4
D_HEAD = 8     # d_model == n_head * d_head
D_INNER = 64
EXT_LEN = 0
MEM_LEN = 4
LN_EPS = 1e-5


# ----------------------------------- kernel ---------------------------------------
def encoder_layer_kernel(x_ref, mask_ref, r3_ref, wqkv_ref, wo_ref, rbias_ref,
                         lnpack_ref, w1_ref, b1_ref, w2_ref, o_ref):
    T_ = x_ref.shape[1]
    D = x_ref.shape[2]
    H, _, Dh = r3_ref.shape
    scale = 1.0 / math.sqrt(Dh)
    W = 2 * T_ + 1                                  # slab width for rel_shift

    w = x_ref[0]                                    # (T, D)
    xb = jnp.broadcast_to(w[None, :, :], (H, T_, D))  # (H, T, D), head-batched view of x

    # head-batched projections (weights are pre-arranged head-major in the wrapper)
    q3 = jnp.einsum('htd,hdf->htf', xb, wqkv_ref[0], preferred_element_type=jnp.float32)
    k3 = jnp.einsum('htd,hdf->htf', xb, wqkv_ref[1], preferred_element_type=jnp.float32)
    v3 = jnp.einsum('htd,hdf->htf', xb, wqkv_ref[2], preferred_element_type=jnp.float32)

    rw_q = q3 + rbias_ref[0]                        # (H, T, Dh), bias added once for all heads
    rr_q = q3 + rbias_ref[1]

    ac = jnp.einsum('htd,hkd->htk', rw_q, k3, preferred_element_type=jnp.float32)       # (H,T,T)
    bd_raw = jnp.einsum('htd,hkd->htk', rr_q, r3_ref[...],
                        preferred_element_type=jnp.float32)                              # (H,T,T)

    # ---- canonical TXL _rel_shift, O(T^2 log T), fully vectorised ----------------
    # desired: bd[h,i,j] = bd_raw[h,i,T-1-i+j]   if j <= i
    #                    = 0                     if j == i+1
    #                    = bd_raw[h,i+1,j-i-2]   if j >= i+2     (the "wrap" values)
    # Build slab[h,i,:] = [ bd_raw[h,i+1,:], bd_raw[h,i,:], 0 ]  (width W = 2T+1) and
    # rotate row i right by (i+2); the first T columns are exactly bd.
    bd_next = jnp.concatenate(
        [bd_raw[:, 1:, :], jnp.zeros((H, 1, T_), jnp.float32)], axis=1)                  # (H,T,T)
    slab = jnp.concatenate(
        [bd_next, bd_raw, jnp.zeros((H, T_, 1), jnp.float32)], axis=2)                   # (H,T,W)
    shift = jax.lax.broadcasted_iota(jnp.int32, (T_, 1), 0) + 2                          # (T,1)
    y_s = slab
    for bit in range((T_ + 1).bit_length()):        # barrel shifter: log2(T+2) static rolls
        amt = 1 << bit
        rolled = jnp.concatenate([y_s[:, :, W - amt:], y_s[:, :, :W - amt]], axis=2)
        take = ((shift >> bit) & 1) > 0             # per-query-row (sublane) select
        y_s = jnp.where(take, rolled, y_s)
    bd = y_s[:, :, :T_]                             # (H,T,T)

    # ---- scores: scale + key-padding mask + softmax, applied once on (H,T,T) -----
    score = (ac + bd) * scale
    key_pad = mask_ref[...]                         # (1,1,T), 1.0 => padded key
    score = jnp.where(key_pad > 0.5, jnp.float32(-1e30), score)

    m = jnp.max(score, axis=-1, keepdims=True)
    e = jnp.exp(score - m)
    l = jnp.sum(e, axis=-1, keepdims=True)
    prob = e * pl.reciprocal(l, approx=True)

    ctx = jnp.einsum('htk,hkd->htd', prob, v3, preferred_element_type=jnp.float32)       # (H,T,Dh)
    per_head = jnp.einsum('htd,hdf->htf', ctx, wo_ref[...],
                          preferred_element_type=jnp.float32)                            # (H,T,D)
    # sum the H output slabs (H-1 vector adds; kept as explicit adds to avoid a
    # major-axis reduce whose lowering support is less certain)
    attn_out = per_head[0]
    for h in range(1, H):
        attn_out = attn_out + per_head[h]           # (T, D)

    # ---- residual + post-LayerNorm (pre_lnorm = False) ----------------------------
    ln1g = lnpack_ref[0:1, :]
    ln1b = lnpack_ref[1:2, :]
    ln2g = lnpack_ref[2:3, :]
    ln2b = lnpack_ref[3:4, :]
    b2 = lnpack_ref[4:5, :]

    y = w + attn_out
    mu = jnp.mean(y, axis=-1, keepdims=True)
    var = jnp.mean((y - mu) ** 2, axis=-1, keepdims=True)
    y = (y - mu) * jax.lax.rsqrt(var + LN_EPS) * ln1g + ln1b

    # ---- position-wise feed-forward (dropout = identity in eval) ------------------
    h1 = jnp.maximum(
        jnp.dot(y, w1_ref[...], preferred_element_type=jnp.float32) + b1_ref[...], 0.0)
    h2 = jnp.dot(h1, w2_ref[...], preferred_element_type=jnp.float32) + b2
    z = y + h2
    mu2 = jnp.mean(z, axis=-1, keepdims=True)
    var2 = jnp.mean((z - mu2) ** 2, axis=-1, keepdims=True)
    z = (z - mu2) * jax.lax.rsqrt(var2 + LN_EPS) * ln2g + ln2b

    o_ref[0] = z.astype(o_ref.dtype)


# ----------------------------------- glue -----------------------------------------
def make_pos_emb(klen, d_model):
    """RelPositionalEmbedding: sinusoidal embedding of pos_seq = [klen-1 ... 0]."""
    pos_seq = jnp.arange(klen - 1, -1, -1, dtype=jnp.float32)
    inv_freq = 1.0 / (10000.0 ** (jnp.arange(0, d_model, 2, dtype=jnp.float32) / d_model))
    sinusoid = pos_seq[:, None] * inv_freq[None, :]
    return jnp.concatenate([jnp.sin(sinusoid), jnp.cos(sinusoid)], axis=-1)  # (klen, d)


def init_params(key):
    ks = jax.random.split(key, 8)
    s = 0.05
    p = {
        "W_qkv": jax.random.normal(ks[0], (D_MODEL, 3 * N_HEAD * D_HEAD), jnp.float32) * s,
        "W_r":   jax.random.normal(ks[1], (D_MODEL, N_HEAD * D_HEAD), jnp.float32) * s,
        "W_o":   jax.random.normal(ks[2], (N_HEAD * D_HEAD, D_MODEL), jnp.float32) * s,
        "r_w_bias": jax.random.uniform(ks[3], (N_HEAD, D_HEAD), jnp.float32),   # torch.rand
        "r_r_bias": jax.random.uniform(ks[4], (N_HEAD, D_HEAD), jnp.float32),
        "ln1_g": jnp.ones((1, D_MODEL), jnp.float32),
        "ln1_b": jnp.zeros((1, D_MODEL), jnp.float32),
        "W1":   jax.random.normal(ks[5], (D_MODEL, D_INNER), jnp.float32) * s,
        "b1":   jax.random.normal(ks[6], (1, D_INNER), jnp.float32) * s,
        "W2":   jax.random.normal(ks[7], (D_INNER, D_MODEL), jnp.float32) * s,
        "b2":   jnp.zeros((1, D_MODEL), jnp.float32),
        "ln2_g": jnp.ones((1, D_MODEL), jnp.float32),
        "ln2_b": jnp.zeros((1, D_MODEL), jnp.float32),
    }
    return p


def encoder_layer_forward(x, masks, params):
    """x: (B, T, D) float32; masks: (B, 1, T) bool (True = valid). Returns (out, masks)."""
    b, t, d = x.shape
    H, Dh = params["r_w_bias"].shape
    hp = jax.lax.Precision.HIGHEST

    in_mask = jnp.logical_not(masks[:, 0, :]).astype(jnp.float32)[:, None, :]  # (B,1,T), 1=pad

    # --- head-major parameter repack (layout only, done once outside the kernel) ---
    W_qkv = params["W_qkv"]
    wq3 = W_qkv[:, 0 * H * Dh:1 * H * Dh].reshape(d, H, Dh).transpose(1, 0, 2)   # (H,D,Dh)
    wk3 = W_qkv[:, 1 * H * Dh:2 * H * Dh].reshape(d, H, Dh).transpose(1, 0, 2)
    wv3 = W_qkv[:, 2 * H * Dh:3 * H * Dh].reshape(d, H, Dh).transpose(1, 0, 2)
    wqkv3 = jnp.stack([wq3, wk3, wv3], axis=0)                                   # (3,H,D,Dh)
    wo3 = params["W_o"].reshape(H, Dh, d)                                        # (H,Dh,D)
    rbias = jnp.stack([params["r_w_bias"][:, None, :],
                       params["r_r_bias"][:, None, :]], axis=0)                  # (2,H,1,Dh)
    lnpack = jnp.concatenate([params["ln1_g"], params["ln1_b"],
                              params["ln2_g"], params["ln2_b"], params["b2"]], axis=0)  # (5,D)

    # positional embedding + its (input-independent) projection, head-major
    pos_emb = make_pos_emb(t, d)
    r3 = jnp.dot(pos_emb, params["W_r"], precision=hp).reshape(t, H, Dh).transpose(1, 0, 2)

    full = lambda a: pl.BlockSpec(a.shape, lambda bb: (0,) * a.ndim)
    in_specs = [
        pl.BlockSpec((1, t, d), lambda bb: (bb, 0, 0)),     # x
        pl.BlockSpec((1, 1, t), lambda bb: (bb, 0, 0)),     # key padding mask
        full(r3), full(wqkv3), full(wo3), full(rbias), full(lnpack),
        full(params["W1"]), full(params["b1"]), full(params["W2"]),
    ]

    out = pl.pallas_call(
        encoder_layer_kernel,
        out_shape=jax.ShapeDtypeStruct((b, t, d), x.dtype),
        grid_spec=pltpu.PrefetchScalarGridSpec(
            num_scalar_prefetch=0,
            grid=(b,),
            in_specs=in_specs,
            out_specs=pl.BlockSpec((1, t, d), lambda bb: (bb, 0, 0)),
        ),
        compiler_params=pltpu.CompilerParams(dimension_semantics=("parallel",)),
    )(x, in_mask, r3, wqkv3, wo3, rbias, lnpack,
      params["W1"], params["b1"], params["W2"])

    # self.mems update (module state, not part of the returned tensor): hids[beg:end]
    end_idx = 0 + max(0, t - EXT_LEN)
    beg_idx = max(0, end_idx - MEM_LEN)
    _new_mems = jnp.transpose(x, (1, 0, 2))[beg_idx:end_idx]        # (mem, B, D), unused here

    # future_len == 0 and tgt_len == T  =>  output is the full hidden sequence
    return out, masks


# ------------------------------ pure-JAX reference ---------------------------------
def _rel_shift_ref(x):
    q, k = x.shape
    xp = jnp.concatenate([jnp.zeros((q, 1), x.dtype), x], axis=1)
    return xp.reshape(-1)[q:].reshape(q, k)


def _layer_norm(x, g, b):
    mu = jnp.mean(x, axis=-1, keepdims=True)
    var = jnp.mean((x - mu) ** 2, axis=-1, keepdims=True)
    return (x - mu) * jax.lax.rsqrt(var + LN_EPS) * g + b


def reference_forward(x, masks, p):
    hp = jax.lax.Precision.HIGHEST
    b, t, d = x.shape
    H, Dh = p["r_w_bias"].shape
    scale = 1.0 / math.sqrt(Dh)
    in_mask = jnp.logical_not(masks[:, 0, :])
    pos_emb = make_pos_emb(t, d)
    r_k = jnp.dot(pos_emb, p["W_r"], precision=hp)
    outs = []
    for bi in range(b):
        w = x[bi]
        heads = jnp.dot(w, p["W_qkv"], precision=hp)
        vecs = []
        for h in range(H):
            q = heads[:, h * Dh:(h + 1) * Dh]
            k = heads[:, H * Dh + h * Dh: H * Dh + (h + 1) * Dh]
            v = heads[:, 2 * H * Dh + h * Dh: 2 * H * Dh + (h + 1) * Dh]
            r = r_k[:, h * Dh:(h + 1) * Dh]
            ac = jnp.dot(q + p["r_w_bias"][h], k.T, precision=hp)
            bd = _rel_shift_ref(jnp.dot(q + p["r_r_bias"][h], r.T, precision=hp))
            s = (ac + bd) * scale
            s = jnp.where(in_mask[bi][None, :], -1e30, s)
            prob = jax.nn.softmax(s, axis=-1)
            vecs.append(jnp.dot(prob, v, precision=hp))
        av = jnp.concatenate(vecs, axis=1)
        y = _layer_norm(w + jnp.dot(av, p["W_o"], precision=hp), p["ln1_g"], p["ln1_b"])
        h1 = jax.nn.relu(jnp.dot(y, p["W1"], precision=hp) + p["b1"])
        h2 = jnp.dot(h1, p["W2"], precision=hp) + p["b2"]
        outs.append(_layer_norm(y + h2, p["ln2_g"], p["ln2_b"]))
    return jnp.stack(outs, axis=0)


# ----------------------------------- main ------------------------------------------
if __name__ == "__main__":
    key = jax.random.PRNGKey(0)
    k_x, k_p = jax.random.split(key)
    x = jax.random.normal(k_x, (B, T, D_MODEL), jnp.float32)
    # masks: (B, 1, T) bool, True = valid frame (last two frames of batch 1 padded)
    masks = jnp.ones((B, 1, T), dtype=bool).at[1, 0, T - 2:].set(False)
    params = init_params(k_p)

    out, out_masks = encoder_layer_forward(x, masks, params)
    out = jax.block_until_ready(out)

    ref = reference_forward(x, masks, params)
    assert out.shape == (B, T, D_MODEL)
    assert jnp.allclose(out, ref, rtol=1e-2, atol=1e-2), "mismatch vs pure-JAX reference"

    print("KERNEL_OK")
</pallas_src>

<mosaic_0001>
module attributes {stable_mosaic.version = 11 : i64} {
  func.func @encoder_layer_kernel(%arg0: i32, %arg1: memref<1x8x32xf32, #tpu.memory_space<vmem>>, %arg2: memref<1x1x8xf32, #tpu.memory_space<vmem>>, %arg3: memref<4x8x8xf32, #tpu.memory_space<vmem>>, %arg4: memref<3x4x32x8xf32, #tpu.memory_space<vmem>>, %arg5: memref<4x8x32xf32, #tpu.memory_space<vmem>>, %arg6: memref<2x4x1x8xf32, #tpu.memory_space<vmem>>, %arg7: memref<5x32xf32, #tpu.memory_space<vmem>>, %arg8: memref<32x64xf32, #tpu.memory_space<vmem>>, %arg9: memref<1x64xf32, #tpu.memory_space<vmem>>, %arg10: memref<64x32xf32, #tpu.memory_space<vmem>>, %arg11: memref<1x8x32xf32, #tpu.memory_space<vmem>>) attributes {dimension_semantics = [#tpu.dimension_semantics<parallel>], iteration_bounds = array<i64: 2>, scalar_prefetch = 0 : i64, scratch_operands = 0 : i64, tpu.core_type = #tpu.core_type<tc>, window_params = [{transform_indices = @transform_0, window_bounds = array<i64: 1, 8, 32>}, {transform_indices = @transform_1, window_bounds = array<i64: 1, 1, 8>}, {pipeline_mode = #tpu.pipeline_mode<synchronous>, transform_indices = @transform_2, window_bounds = array<i64: 4, 8, 8>}, {pipeline_mode = #tpu.pipeline_mode<synchronous>, transform_indices = @transform_3, window_bounds = array<i64: 3, 4, 32, 8>}, {pipeline_mode = #tpu.pipeline_mode<synchronous>, transform_indices = @transform_4, window_bounds = array<i64: 4, 8, 32>}, {pipeline_mode = #tpu.pipeline_mode<synchronous>, transform_indices = @transform_5, window_bounds = array<i64: 2, 4, 1, 8>}, {pipeline_mode = #tpu.pipeline_mode<synchronous>, transform_indices = @transform_6, window_bounds = array<i64: 5, 32>}, {pipeline_mode = #tpu.pipeline_mode<synchronous>, transform_indices = @transform_7, window_bounds = array<i64: 32, 64>}, {pipeline_mode = #tpu.pipeline_mode<synchronous>, transform_indices = @transform_8, window_bounds = array<i64: 1, 64>}, {pipeline_mode = #tpu.pipeline_mode<synchronous>, transform_indices = @transform_9, window_bounds = array<i64: 64, 32>}, {transform_indices = @transform_10, window_bounds = array<i64: 1, 8, 32>}]} {
    %c0 = arith.constant 0 : index
    %c0_0 = arith.constant 0 : index
    %c0_1 = arith.constant 0 : index
    %0 = vector.load %arg1[%c0, %c0_0, %c0_1] : memref<1x8x32xf32, #tpu.memory_space<vmem>>, vector<1x8x32xf32>
    %1 = vector.shape_cast %0 : vector<1x8x32xf32> to vector<8x32xf32>
    %2 = vector.shape_cast %1 : vector<8x32xf32> to vector<1x8x32xf32>
    %3 = vector.shape_cast %2 : vector<1x8x32xf32> to vector<1x8x32xf32>
    %4 = vector.broadcast %3 : vector<1x8x32xf32> to vector<4x8x32xf32>
    %c0_2 = arith.constant 0 : index
    %c0_3 = arith.constant 0 : index
    %c0_4 = arith.constant 0 : index
    %c0_5 = arith.constant 0 : index
    %5 = vector.load %arg4[%c0_2, %c0_3, %c0_4, %c0_5] : memref<3x4x32x8xf32, #tpu.memory_space<vmem>>, vector<1x4x32x8xf32>
    %6 = vector.shape_cast %5 : vector<1x4x32x8xf32> to vector<4x32x8xf32>
    "tpu.trace_start"() <{level = 10 : i32, message = "htd,hdf->htf"}> : () -> ()
    %cst = arith.constant dense<0.000000e+00> : vector<4x8x8xf32>
    %7 = tpu.matmul %4, %6, %cst {dimension_numbers = #tpu.dot_dimension_numbers<[2], [1], [1], [2], [0, 0, 0, 1, 1, 2], [0], [0]>} : vector<4x8x32xf32>, vector<4x32x8xf32>, vector<4x8x8xf32> -> vector<4x8x8xf32>
    "tpu.trace_stop"() : () -> ()
    %c1 = arith.constant 1 : index
    %c0_6 = arith.constant 0 : index
    %c0_7 = arith.constant 0 : index
    %c0_8 = arith.constant 0 : index
    %8 = vector.load %arg4[%c1, %c0_6, %c0_7, %c0_8] : memref<3x4x32x8xf32, #tpu.memory_space<vmem>>, vector<1x4x32x8xf32>
    %9 = vector.shape_cast %8 : vector<1x4x32x8xf32> to vector<4x32x8xf32>
    "tpu.trace_start"() <{level = 10 : i32, message = "htd,hdf->htf"}> : () -> ()
    %cst_9 = arith.constant dense<0.000000e+00> : vector<4x8x8xf32>
    %10 = tpu.matmul %4, %9, %cst_9 {dimension_numbers = #tpu.dot_dimension_numbers<[2], [1], [1], [2], [0, 0, 0, 1, 1, 2], [0], [0]>} : vector<4x8x32xf32>, vector<4x32x8xf32>, vector<4x8x8xf32> -> vector<4x8x8xf32>
    "tpu.trace_stop"() : () -> ()
    %c2 = arith.constant 2 : index
    %c0_10 = arith.constant 0 : index
    %c0_11 = arith.constant 0 : index
    %c0_12 = arith.constant 0 : index
    %11 = vector.load %arg4[%c2, %c0_10, %c0_11, %c0_12] : memref<3x4x32x8xf32, #tpu.memory_space<vmem>>, vector<1x4x32x8xf32>
    %12 = vector.shape_cast %11 : vector<1x4x32x8xf32> to vector<4x32x8xf32>
    "tpu.trace_start"() <{level = 10 : i32, message = "htd,hdf->htf"}> : () -> ()
    %cst_13 = arith.constant dense<0.000000e+00> : vector<4x8x8xf32>
    %13 = tpu.matmul %4, %12, %cst_13 {dimension_numbers = #tpu.dot_dimension_numbers<[2], [1], [1], [2], [0, 0, 0, 1, 1, 2], [0], [0]>} : vector<4x8x32xf32>, vector<4x32x8xf32>, vector<4x8x8xf32> -> vector<4x8x8xf32>
    "tpu.trace_stop"() : () -> ()
    %c0_14 = arith.constant 0 : index
    %c0_15 = arith.constant 0 : index
    %c0_16 = arith.constant 0 : index
    %c0_17 = arith.constant 0 : index
    %14 = vector.load %arg6[%c0_14, %c0_15, %c0_16, %c0_17] : memref<2x4x1x8xf32, #tpu.memory_space<vmem>>, vector<1x4x1x8xf32>
    %15 = vector.shape_cast %14 : vector<1x4x1x8xf32> to vector<4x1x8xf32>
    %16 = vector.broadcast %15 : vector<4x1x8xf32> to vector<4x8x8xf32>
    %17 = arith.addf %7, %16 : vector<4x8x8xf32>
    %c1_18 = arith.constant 1 : index
    %c0_19 = arith.constant 0 : index
    %c0_20 = arith.constant 0 : index
    %c0_21 = arith.constant 0 : index
    %18 = vector.load %arg6[%c1_18, %c0_19, %c0_20, %c0_21] : memref<2x4x1x8xf32, #tpu.memory_space<vmem>>, vector<1x4x1x8xf32>
    %19 = vector.shape_cast %18 : vector<1x4x1x8xf32> to vector<4x1x8xf32>
    %20 = vector.broadcast %19 : vector<4x1x8xf32> to vector<4x8x8xf32>
    %21 = arith.addf %7, %20 : vector<4x8x8xf32>
    "tpu.trace_start"() <{level = 10 : i32, message = "htd,hkd->htk"}> : () -> ()
    %cst_22 = arith.constant dense<0.000000e+00> : vector<4x8x8xf32>
    %22 = tpu.matmul %17, %10, %cst_22 {dimension_numbers = #tpu.dot_dimension_numbers<[2], [2], [1], [1], [0, 0, 0, 1, 1, 1], [0], [0]>} : vector<4x8x8xf32>, vector<4x8x8xf32>, vector<4x8x8xf32> -> vector<4x8x8xf32>
    "tpu.trace_stop"() : () -> ()
    %c0_23 = arith.constant 0 : index
    %c0_24 = arith.constant 0 : index
    %c0_25 = arith.constant 0 : index
    %23 = vector.load %arg3[%c0_23, %c0_24, %c0_25] : memref<4x8x8xf32, #tpu.memory_space<vmem>>, vector<4x8x8xf32>
    "tpu.trace_start"() <{level = 10 : i32, message = "htd,hkd->htk"}> : () -> ()
    %cst_26 = arith.constant dense<0.000000e+00> : vector<4x8x8xf32>
    %24 = tpu.matmul %21, %23, %cst_26 {dimension_numbers = #tpu.dot_dimension_numbers<[2], [2], [1], [1], [0, 0, 0, 1, 1, 1], [0], [0]>} : vector<4x8x8xf32>, vector<4x8x8xf32>, vector<4x8x8xf32> -> vector<4x8x8xf32>
    "tpu.trace_stop"() : () -> ()
    %25 = vector.extract_strided_slice %24 {offsets = [0, 1, 0], sizes = [4, 7, 8], strides = [1, 1, 1]} : vector<4x8x8xf32> to vector<4x7x8xf32>
    %cst_27 = arith.constant 0.000000e+00 : f32
    %26 = vector.broadcast %cst_27 : f32 to vector<4x1x8xf32>
    %27 = tpu.concatenate %25, %26 in 1 : vector<4x7x8xf32>, vector<4x1x8xf32> -> vector<4x8x8xf32>
    %cst_28 = arith.constant 0.000000e+00 : f32
    %28 = vector.broadcast %cst_28 : f32 to vector<4x8x1xf32>
    %29 = tpu.concatenate %27, %24, %28 in 2 : vector<4x8x8xf32>, vector<4x8x8xf32>, vector<4x8x1xf32> -> vector<4x8x17xf32>
    %30 = tpu.iota {dimensions = array<i32: 0>} : vector<8x1xi32>
    %c2_i32 = arith.constant 2 : i32
    %31 = vector.broadcast %c2_i32 : i32 to vector<8x1xi32>
    %32 = arith.addi %30, %31 : vector<8x1xi32>
    %33 = vector.extract_strided_slice %29 {offsets = [0, 0, 16], sizes = [4, 8, 1], strides = [1, 1, 1]} : vector<4x8x17xf32> to vector<4x8x1xf32>
    %34 = vector.extract_strided_slice %29 {offsets = [0, 0, 0], sizes = [4, 8, 16], strides = [1, 1, 1]} : vector<4x8x17xf32> to vector<4x8x16xf32>
    %35 = tpu.concatenate %33, %34 in 2 : vector<4x8x1xf32>, vector<4x8x16xf32> -> vector<4x8x17xf32>
    %c0_i32 = arith.constant 0 : i32
    %36 = vector.broadcast %c0_i32 : i32 to vector<8x1xi32>
    %37 = arith.shrsi %32, %36 : vector<8x1xi32>
    %c1_i32 = arith.constant 1 : i32
    %38 = vector.broadcast %c1_i32 : i32 to vector<8x1xi32>
    %39 = arith.andi %37, %38 : vector<8x1xi32>
    %c0_i32_29 = arith.constant 0 : i32
    %40 = vector.broadcast %c0_i32_29 : i32 to vector<8x1xi32>
    %41 = arith.cmpi sgt, %39, %40 : vector<8x1xi32>
    %42 = vector.shape_cast %41 : vector<8x1xi1> to vector<1x8x1xi1>
    %43 = vector.broadcast %42 : vector<1x8x1xi1> to vector<4x8x17xi1>
    %44 = arith.select %43, %35, %29 : vector<4x8x17xi1>, vector<4x8x17xf32>
    %45 = vector.extract_strided_slice %44 {offsets = [0, 0, 15], sizes = [4, 8, 2], strides = [1, 1, 1]} : vector<4x8x17xf32> to vector<4x8x2xf32>
    %46 = vector.extract_strided_slice %44 {offsets = [0, 0, 0], sizes = [4, 8, 15], strides = [1, 1, 1]} : vector<4x8x17xf32> to vector<4x8x15xf32>
    %47 = tpu.concatenate %45, %46 in 2 : vector<4x8x2xf32>, vector<4x8x15xf32> -> vector<4x8x17xf32>
    %c1_i32_30 = arith.constant 1 : i32
    %48 = vector.broadcast %c1_i32_30 : i32 to vector<8x1xi32>
    %49 = arith.shrsi %32, %48 : vector<8x1xi32>
    %c1_i32_31 = arith.constant 1 : i32
    %50 = vector.broadcast %c1_i32_31 : i32 to vector<8x1xi32>
    %51 = arith.andi %49, %50 : vector<8x1xi32>
    %c0_i32_32 = arith.constant 0 : i32
    %52 = vector.broadcast %c0_i32_32 : i32 to vector<8x1xi32>
    %53 = arith.cmpi sgt, %51, %52 : vector<8x1xi32>
    %54 = vector.shape_cast %53 : vector<8x1xi1> to vector<1x8x1xi1>
    %55 = vector.broadcast %54 : vector<1x8x1xi1> to vector<4x8x17xi1>
    %56 = arith.select %55, %47, %44 : vector<4x8x17xi1>, vector<4x8x17xf32>
    %57 = vector.extract_strided_slice %56 {offsets = [0, 0, 13], sizes = [4, 8, 4], strides = [1, 1, 1]} : vector<4x8x17xf32> to vector<4x8x4xf32>
    %58 = vector.extract_strided_slice %56 {offsets = [0, 0, 0], sizes = [4, 8, 13], strides = [1, 1, 1]} : vector<4x8x17xf32> to vector<4x8x13xf32>
    %59 = tpu.concatenate %57, %58 in 2 : vector<4x8x4xf32>, vector<4x8x13xf32> -> vector<4x8x17xf32>
    %c2_i32_33 = arith.constant 2 : i32
    %60 = vector.broadcast %c2_i32_33 : i32 to vector<8x1xi32>
    %61 = arith.shrsi %32, %60 : vector<8x1xi32>
    %c1_i32_34 = arith.constant 1 : i32
    %62 = vector.broadcast %c1_i32_34 : i32 to vector<8x1xi32>
    %63 = arith.andi %61, %62 : vector<8x1xi32>
    %c0_i32_35 = arith.constant 0 : i32
    %64 = vector.broadcast %c0_i32_35 : i32 to vector<8x1xi32>
    %65 = arith.cmpi sgt, %63, %64 : vector<8x1xi32>
    %66 = vector.shape_cast %65 : vector<8x1xi1> to vector<1x8x1xi1>
    %67 = vector.broadcast %66 : vector<1x8x1xi1> to vector<4x8x17xi1>
    %68 = arith.select %67, %59, %56 : vector<4x8x17xi1>, vector<4x8x17xf32>
    %69 = vector.extract_strided_slice %68 {offsets = [0, 0, 9], sizes = [4, 8, 8], strides = [1, 1, 1]} : vector<4x8x17xf32> to vector<4x8x8xf32>
    %70 = vector.extract_strided_slice %68 {offsets = [0, 0, 0], sizes = [4, 8, 9], strides = [1, 1, 1]} : vector<4x8x17xf32> to vector<4x8x9xf32>
    %71 = tpu.concatenate %69, %70 in 2 : vector<4x8x8xf32>, vector<4x8x9xf32> -> vector<4x8x17xf32>
    %c3_i32 = arith.constant 3 : i32
    %72 = vector.broadcast %c3_i32 : i32 to vector<8x1xi32>
    %73 = arith.shrsi %32, %72 : vector<8x1xi32>
    %c1_i32_36 = arith.constant 1 : i32
    %74 = vector.broadcast %c1_i32_36 : i32 to vector<8x1xi32>
    %75 = arith.andi %73, %74 : vector<8x1xi32>
    %c0_i32_37 = arith.constant 0 : i32
    %76 = vector.broadcast %c0_i32_37 : i32 to vector<8x1xi32>
    %77 = arith.cmpi sgt, %75, %76 : vector<8x1xi32>
    %78 = vector.shape_cast %77 : vector<8x1xi1> to vector<1x8x1xi1>
    %79 = vector.broadcast %78 : vector<1x8x1xi1> to vector<4x8x17xi1>
    %80 = arith.select %79, %71, %68 : vector<4x8x17xi1>, vector<4x8x17xf32>
    %81 = vector.extract_strided_slice %80 {offsets = [0, 0, 0], sizes = [4, 8, 8], strides = [1, 1, 1]} : vector<4x8x17xf32> to vector<4x8x8xf32>
    %82 = arith.addf %22, %81 : vector<4x8x8xf32>
    %cst_38 = arith.constant 0.353553385 : f32
    %83 = vector.broadcast %cst_38 : f32 to vector<4x8x8xf32>
    %84 = arith.mulf %82, %83 : vector<4x8x8xf32>
    %c0_39 = arith.constant 0 : index
    %c0_40 = arith.constant 0 : index
    %c0_41 = arith.constant 0 : index
    %85 = vector.load %arg2[%c0_39, %c0_40, %c0_41] : memref<1x1x8xf32, #tpu.memory_space<vmem>>, vector<1x1x8xf32>
    %cst_42 = arith.constant 5.000000e-01 : f32
    %86 = vector.broadcast %cst_42 : f32 to vector<1x1x8xf32>
    %87 = arith.cmpf ogt, %85, %86 : vector<1x1x8xf32>
    %cst_43 = arith.constant -1.000000e+30 : f32
    %88 = vector.shape_cast %87 : vector<1x1x8xi1> to vector<1x1x8xi1>
    %89 = vector.broadcast %88 : vector<1x1x8xi1> to vector<4x8x8xi1>
    %90 = vector.broadcast %cst_43 : f32 to vector<4x8x8xf32>
    %91 = arith.select %89, %90, %84 : vector<4x8x8xi1>, vector<4x8x8xf32>
    %cst_44 = arith.constant dense<0xFF800000> : vector<4x8xf32>
    %92 = vector.multi_reduction <maximumf>, %91, %cst_44 [2] : vector<4x8x8xf32> to vector<4x8xf32>
    %93 = vector.shape_cast %92 : vector<4x8xf32> to vector<4x8x1xf32>
    %94 = vector.broadcast %93 : vector<4x8x1xf32> to vector<4x8x8xf32>
    %95 = arith.subf %91, %94 : vector<4x8x8xf32>
    %96 = math.exp %95 : vector<4x8x8xf32>
    %cst_45 = arith.constant dense<0.000000e+00> : vector<4x8xf32>
    %97 = vector.multi_reduction <add>, %96, %cst_45 [2] : vector<4x8x8xf32> to vector<4x8xf32>
    %98 = vector.shape_cast %97 : vector<4x8xf32> to vector<4x8x1xf32>
    %99 = tpu.reciprocal %98 {approx = true} : vector<4x8x1xf32> -> vector<4x8x1xf32>
    %100 = vector.broadcast %99 : vector<4x8x1xf32> to vector<4x8x8xf32>
    %101 = arith.mulf %96, %100 : vector<4x8x8xf32>
    "tpu.trace_start"() <{level = 10 : i32, message = "htk,hkd->htd"}> : () -> ()
    %cst_46 = arith.constant dense<0.000000e+00> : vector<4x8x8xf32>
    %102 = tpu.matmul %101, %13, %cst_46 {dimension_numbers = #tpu.dot_dimension_numbers<[2], [1], [1], [2], [0, 0, 0, 1, 1, 2], [0], [0]>} : vector<4x8x8xf32>, vector<4x8x8xf32>, vector<4x8x8xf32> -> vector<4x8x8xf32>
    "tpu.trace_stop"() : () -> ()
    %c0_47 = arith.constant 0 : index
    %c0_48 = arith.constant 0 : index
    %c0_49 = arith.constant 0 : index
    %103 = vector.load %arg5[%c0_47, %c0_48, %c0_49] : memref<4x8x32xf32, #tpu.memory_space<vmem>>, vector<4x8x32xf32>
    "tpu.trace_start"() <{level = 10 : i32, message = "htd,hdf->htf"}> : () -> ()
    %cst_50 = arith.constant dense<0.000000e+00> : vector<4x8x32xf32>
    %104 = tpu.matmul %102, %103, %cst_50 {dimension_numbers = #tpu.dot_dimension_numbers<[2], [1], [1], [2], [0, 0, 0, 1, 1, 2], [0], [0]>} : vector<4x8x8xf32>, vector<4x8x32xf32>, vector<4x8x32xf32> -> vector<4x8x32xf32>
    "tpu.trace_stop"() : () -> ()
    %105 = vector.extract_strided_slice %104 {offsets = [0, 0, 0], sizes = [1, 8, 32], strides = [1, 1, 1]} : vector<4x8x32xf32> to vector<1x8x32xf32>
    %106 = vector.shape_cast %105 : vector<1x8x32xf32> to vector<8x32xf32>
    %107 = vector.extract_strided_slice %104 {offsets = [1, 0, 0], sizes = [1, 8, 32], strides = [1, 1, 1]} : vector<4x8x32xf32> to vector<1x8x32xf32>
    %108 = vector.shape_cast %107 : vector<1x8x32xf32> to vector<8x32xf32>
    %109 = arith.addf %106, %108 : vector<8x32xf32>
    %110 = vector.extract_strided_slice %104 {offsets = [2, 0, 0], sizes = [1, 8, 32], strides = [1, 1, 1]} : vector<4x8x32xf32> to vector<1x8x32xf32>
    %111 = vector.shape_cast %110 : vector<1x8x32xf32> to vector<8x32xf32>
    %112 = arith.addf %109, %111 : vector<8x32xf32>
    %113 = vector.extract_strided_slice %104 {offsets = [3, 0, 0], sizes = [1, 8, 32], strides = [1, 1, 1]} : vector<4x8x32xf32> to vector<1x8x32xf32>
    %114 = vector.shape_cast %113 : vector<1x8x32xf32> to vector<8x32xf32>
    %115 = arith.addf %112, %114 : vector<8x32xf32>
    %c0_51 = arith.constant 0 : index
    %c0_52 = arith.constant 0 : index
    %116 = vector.load %arg7[%c0_51, %c0_52] : memref<5x32xf32, #tpu.memory_space<vmem>>, vector<1x32xf32>
    %c1_53 = arith.constant 1 : index
    %c0_54 = arith.constant 0 : index
    %117 = vector.load %arg7[%c1_53, %c0_54] : memref<5x32xf32, #tpu.memory_space<vmem>>, vector<1x32xf32>
    %c2_55 = arith.constant 2 : index
    %c0_56 = arith.constant 0 : index
    %118 = vector.load %arg7[%c2_55, %c0_56] : memref<5x32xf32, #tpu.memory_space<vmem>>, vector<1x32xf32>
    %c3 = arith.constant 3 : index
    %c0_57 = arith.constant 0 : index
    %119 = vector.load %arg7[%c3, %c0_57] : memref<5x32xf32, #tpu.memory_space<vmem>>, vector<1x32xf32>
    %c4 = arith.constant 4 : index
    %c0_58 = arith.constant 0 : index
    %120 = vector.load %arg7[%c4, %c0_58] : memref<5x32xf32, #tpu.memory_space<vmem>>, vector<1x32xf32>
    %121 = arith.addf %1, %115 : vector<8x32xf32>
    %cst_59 = arith.constant dense<0.000000e+00> : vector<8xf32>
    %122 = vector.multi_reduction <add>, %121, %cst_59 [1] : vector<8x32xf32> to vector<8xf32>
    %123 = vector.shape_cast %122 : vector<8xf32> to vector<8x1xf32>
    %cst_60 = arith.constant 3.200000e+01 : f32
    %124 = vector.broadcast %cst_60 : f32 to vector<8x1xf32>
    %125 = arith.divf %123, %124 : vector<8x1xf32>
    %126 = vector.broadcast %125 : vector<8x1xf32> to vector<8x32xf32>
    %127 = arith.subf %121, %126 : vector<8x32xf32>
    %128 = arith.mulf %127, %127 : vector<8x32xf32>
    %cst_61 = arith.constant dense<0.000000e+00> : vector<8xf32>
    %129 = vector.multi_reduction <add>, %128, %cst_61 [1] : vector<8x32xf32> to vector<8xf32>
    %130 = vector.shape_cast %129 : vector<8xf32> to vector<8x1xf32>
    %cst_62 = arith.constant 3.200000e+01 : f32
    %131 = vector.broadcast %cst_62 : f32 to vector<8x1xf32>
    %132 = arith.divf %130, %131 : vector<8x1xf32>
    %133 = vector.broadcast %125 : vector<8x1xf32> to vector<8x32xf32>
    %134 = arith.subf %121, %133 : vector<8x32xf32>
    %cst_63 = arith.constant 9.99999974E-6 : f32
    %135 = vector.broadcast %cst_63 : f32 to vector<8x1xf32>
    %136 = arith.addf %132, %135 : vector<8x1xf32>
    %137 = math.rsqrt %136 : vector<8x1xf32>
    %138 = vector.broadcast %137 : vector<8x1xf32> to vector<8x32xf32>
    %139 = arith.mulf %134, %138 : vector<8x32xf32>
    %140 = vector.broadcast %116 : vector<1x32xf32> to vector<8x32xf32>
    %141 = arith.mulf %139, %140 : vector<8x32xf32>
    %142 = vector.broadcast %117 : vector<1x32xf32> to vector<8x32xf32>
    %143 = arith.addf %141, %142 : vector<8x32xf32>
    %c0_64 = arith.constant 0 : index
    %c0_65 = arith.constant 0 : index
    %144 = vector.load %arg8[%c0_64, %c0_65] : memref<32x64xf32, #tpu.memory_space<vmem>>, vector<32x64xf32>
    %cst_66 = arith.constant dense<0.000000e+00> : vector<8x64xf32>
    %145 = tpu.matmul %143, %144, %cst_66 {dimension_numbers = #tpu.dot_dimension_numbers<[1], [0], [0], [1], [0, 0, 1, 1], [], []>} : vector<8x32xf32>, vector<32x64xf32>, vector<8x64xf32> -> vector<8x64xf32>
    %c0_67 = arith.constant 0 : index
    %c0_68 = arith.constant 0 : index
    %146 = vector.load %arg9[%c0_67, %c0_68] : memref<1x64xf32, #tpu.memory_space<vmem>>, vector<1x64xf32>
    %147 = vector.broadcast %146 : vector<1x64xf32> to vector<8x64xf32>
    %148 = arith.addf %145, %147 : vector<8x64xf32>
    %cst_69 = arith.constant 0.000000e+00 : f32
    %149 = vector.broadcast %cst_69 : f32 to vector<8x64xf32>
    %150 = arith.maximumf %148, %149 : vector<8x64xf32>
    %c0_70 = arith.constant 0 : index
    %c0_71 = arith.constant 0 : index
    %151 = vector.load %arg10[%c0_70, %c0_71] : memref<64x32xf32, #tpu.memory_space<vmem>>, vector<64x32xf32>
    %cst_72 = arith.constant dense<0.000000e+00> : vector<8x32xf32>
    %152 = tpu.matmul %150, %151, %cst_72 {dimension_numbers = #tpu.dot_dimension_numbers<[1], [0], [0], [1], [0, 0, 1, 1], [], []>} : vector<8x64xf32>, vector<64x32xf32>, vector<8x32xf32> -> vector<8x32xf32>
    %153 = vector.broadcast %120 : vector<1x32xf32> to vector<8x32xf32>
    %154 = arith.addf %152, %153 : vector<8x32xf32>
    %155 = arith.addf %143, %154 : vector<8x32xf32>
    %cst_73 = arith.constant dense<0.000000e+00> : vector<8xf32>
    %156 = vector.multi_reduction <add>, %155, %cst_73 [1] : vector<8x32xf32> to vector<8xf32>
    %157 = vector.shape_cast %156 : vector<8xf32> to vector<8x1xf32>
    %cst_74 = arith.constant 3.200000e+01 : f32
    %158 = vector.broadcast %cst_74 : f32 to vector<8x1xf32>
    %159 = arith.divf %157, %158 : vector<8x1xf32>
    %160 = vector.broadcast %159 : vector<8x1xf32> to vector<8x32xf32>
    %161 = arith.subf %155, %160 : vector<8x32xf32>
    %162 = arith.mulf %161, %161 : vector<8x32xf32>
    %cst_75 = arith.constant dense<0.000000e+00> : vector<8xf32>
    %163 = vector.multi_reduction <add>, %162, %cst_75 [1] : vector<8x32xf32> to vector<8xf32>
    %164 = vector.shape_cast %163 : vector<8xf32> to vector<8x1xf32>
    %cst_76 = arith.constant 3.200000e+01 : f32
    %165 = vector.broadcast %cst_76 : f32 to vector<8x1xf32>
    %166 = arith.divf %164, %165 : vector<8x1xf32>
    %167 = vector.broadcast %159 : vector<8x1xf32> to vector<8x32xf32>
    %168 = arith.subf %155, %167 : vector<8x32xf32>
    %cst_77 = arith.constant 9.99999974E-6 : f32
    %169 = vector.broadcast %cst_77 : f32 to vector<8x1xf32>
    %170 = arith.addf %166, %169 : vector<8x1xf32>
    %171 = math.rsqrt %170 : vector<8x1xf32>
    %172 = vector.broadcast %171 : vector<8x1xf32> to vector<8x32xf32>
    %173 = arith.mulf %168, %172 : vector<8x32xf32>
    %174 = vector.broadcast %118 : vector<1x32xf32> to vector<8x32xf32>
    %175 = arith.mulf %173, %174 : vector<8x32xf32>
    %176 = vector.broadcast %119 : vector<1x32xf32> to vector<8x32xf32>
    %177 = arith.addf %175, %176 : vector<8x32xf32>
    %c0_78 = arith.constant 0 : index
    %c0_79 = arith.constant 0 : index
    %c0_80 = arith.constant 0 : index
    %178 = vector.load %arg11[%c0_78, %c0_79, %c0_80] : memref<1x8x32xf32, #tpu.memory_space<vmem>>, vector<1x8x32xf32>
    %179 = vector.shape_cast %178 : vector<1x8x32xf32> to vector<8x32xf32>
    %180 = vector.shape_cast %177 : vector<8x32xf32> to vector<1x8x32xf32>
    tpu.vector_store %arg11[%c0_78, %c0_79, %c0_80], %180 {strides = array<i32>} : memref<1x8x32xf32, #tpu.memory_space<vmem>>, vector<1x8x32xf32>,
    return
  }
  func.func @transform_0(%arg0: i32) -> (i32, i32, i32) {
    %c0_i32 = arith.constant 0 : i32
    %c0_i32_0 = arith.constant 0 : i32
    %c0_i32_1 = arith.constant 0 : i32
    return %arg0, %c0_i32, %c0_i32_0 : i32, i32, i32
  }
  func.func @transform_1(%arg0: i32) -> (i32, i32, i32) {
    %c0_i32 = arith.constant 0 : i32
    %c0_i32_0 = arith.constant 0 : i32
    %c0_i32_1 = arith.constant 0 : i32
    return %arg0, %c0_i32, %c0_i32_0 : i32, i32, i32
  }
  func.func @transform_2(%arg0: i32) -> (i32, i32, i32) {
    %c0_i32 = arith.constant 0 : i32
    %c0_i32_0 = arith.constant 0 : i32
    %c0_i32_1 = arith.constant 0 : i32
    %c0_i32_2 = arith.constant 0 : i32
    return %c0_i32, %c0_i32_0, %c0_i32_1 : i32, i32, i32
  }
  func.func @transform_3(%arg0: i32) -> (i32, i32, i32, i32) {
    %c0_i32 = arith.constant 0 : i32
    %c0_i32_0 = arith.constant 0 : i32
    %c0_i32_1 = arith.constant 0 : i32
    %c0_i32_2 = arith.constant 0 : i32
    %c0_i32_3 = arith.constant 0 : i32
    return %c0_i32, %c0_i32_0, %c0_i32_1, %c0_i32_2 : i32, i32, i32, i32
  }
  func.func @transform_4(%arg0: i32) -> (i32, i32, i32) {
    %c0_i32 = arith.constant 0 : i32
    %c0_i32_0 = arith.constant 0 : i32
    %c0_i32_1 = arith.constant 0 : i32
    %c0_i32_2 = arith.constant 0 : i32
    return %c0_i32, %c0_i32_0, %c0_i32_1 : i32, i32, i32
  }
  func.func @transform_5(%arg0: i32) -> (i32, i32, i32, i32) {
    %c0_i32 = arith.constant 0 : i32
    %c0_i32_0 = arith.constant 0 : i32
    %c0_i32_1 = arith.constant 0 : i32
    %c0_i32_2 = arith.constant 0 : i32
    %c0_i32_3 = arith.constant 0 : i32
    return %c0_i32, %c0_i32_0, %c0_i32_1, %c0_i32_2 : i32, i32, i32, i32
  }
  func.func @transform_6(%arg0: i32) -> (i32, i32) {
    %c0_i32 = arith.constant 0 : i32
    %c0_i32_0 = arith.constant 0 : i32
    %c0_i32_1 = arith.constant 0 : i32
    return %c0_i32, %c0_i32_0 : i32, i32
  }
  func.func @transform_7(%arg0: i32) -> (i32, i32) {
    %c0_i32 = arith.constant 0 : i32
    %c0_i32_0 = arith.constant 0 : i32
    %c0_i32_1 = arith.constant 0 : i32
    return %c0_i32, %c0_i32_0 : i32, i32
  }
  func.func @transform_8(%arg0: i32) -> (i32, i32) {
    %c0_i32 = arith.constant 0 : i32
    %c0_i32_0 = arith.constant 0 : i32
    %c0_i32_1 = arith.constant 0 : i32
    return %c0_i32, %c0_i32_0 : i32, i32
  }
  func.func @transform_9(%arg0: i32) -> (i32, i32) {
    %c0_i32 = arith.constant 0 : i32
    %c0_i32_0 = arith.constant 0 : i32
    %c0_i32_1 = arith.constant 0 : i32
    return %c0_i32, %c0_i32_0 : i32, i32
  }
  func.func @transform_10(%arg0: i32) -> (i32, i32, i32) {
    %c0_i32 = arith.constant 0 : i32
    %c0_i32_0 = arith.constant 0 : i32
    %c0_i32_1 = arith.constant 0 : i32
    return %arg0, %c0_i32, %c0_i32_0 : i32, i32, i32
  }
}

</mosaic_0001>

<bundles_post_ra>
// kernel: tpu_custom_call.1
= control target key start
LH: loop header
LB: loop body
LE: loop exit
PB: predicated region body
PF: predicated region fallthrough
CT: control target
= control target key end

     0   :  { %s4390_s0 = inlined_call_operand.vmem [shape: f32[2,8,32], index: 0, kind: input, shape index: {}]   ;;  %s4391_s1 = inlined_call_operand.vmem [shape: f32[2,1,8], index: 1, kind: input, shape index: {}]   ;;  %s4392_s2 = inlined_call_operand.vmem [shape: f32[4,8,8], index: 2, kind: input, shape index: {}]   ;;  %s4393_s3 = inlined_call_operand.vmem [shape: f32[3,4,32,8], index: 3, kind: input, shape index: {}]   ;;  %s4394_s4 = inlined_call_operand.vmem [shape: f32[4,8,32], index: 4, kind: input, shape index: {}]   ;;  %s4395_s5 = inlined_call_operand.vmem [shape: f32[2,4,1,8], index: 5, kind: input, shape index: {}]   ;;  %s4396_s6 = inlined_call_operand.vmem [shape: f32[5,32], index: 6, kind: input, shape index: {}]   ;;  %s4397_s7 = inlined_call_operand.vmem [shape: f32[32,64], index: 7, kind: input, shape index: {}]   ;;  %s4398_s8 = inlined_call_operand.vmem [shape: f32[1,64], index: 8, kind: input, shape index: {}]   ;;  %s4399_s9 = inlined_call_operand.vmem [shape: f32[64,32], index: 9, kind: input, shape index: {}]   ;;  %s4400_s10 = inlined_call_operand.hbm [shape: f32[2,8,32], index: 10, kind: output, shape index: {}]  }
   0x1   :  { %4401 = sst [smem:[#allocation5_spill]] %s4390_s0 }
   0x2   :  { %4402 = sst [smem:[#allocation6_spill]] %s4391_s1 }
   0x3   :  { %15 = vsyncpa [#allocation3], 0 }
   0x4   :  { %17 = vsyncpa [#allocation3 + $0x1], 0  ;;  %s3754_s13 = smov 0   ;;  %s3756_s14 = smov 0  }
   0x5   :  { %s3758_s15 = smov 0   ;;  %s3760_s16 = smov 0  }
   0x6 LB: > { %s3775_s17 = sadd.s32 4294967295, %s3685_s16   ;;  %s3108_s18 = sadd.s32 4294967294, %s3685_s16   ;;  %s3685_s16 = sphi %s3760_s16, %s4412_s16   ;;  %s3681_s15 = sphi %s3758_s15, %s4411_s15   ;;  %s3677_s14 = sphi %s3756_s14, %s4410_s14   ;;  %s3673_s13 = sphi %s3754_s13, %s4409_s13  }
   0x7   : > { %s3779_s19 = sadd.s32 1, %s3685_s16   ;;  %s250_s20 = sadd.s32 1, %s3681_s15 }
   0x8   : > { %s247_s21 = ssub.s32 %s3685_s16, %s3779_s19  ;;  %p260_p0 = scmp.ne.s32.totalorder %s3681_s15, %s3677_s14 }
   0x9   : > { %p248_p1 = scmp.eq.s32.totalorder %s247_s21, 0  ;;  %p261_p2 = scmp.eq.s32.totalorder %s3775_s17, 1 }
   0xa   : > { %p266_p3 = scmp.ne.s32.totalorder %s3677_s14, %s3673_s13  ;;  %p267_p4 = scmp.eq.s32.totalorder %s3108_s18, 1 }
   0xb   : > { %s3790_s22 = scalar_select %p248_p1, %s3681_s15, %s250_s20  }
   0xc   : > { %p3792_p5 = por %p261_p2, %p260_p0  ;;  %p3796_p6 = por %p267_p4, %p266_p3 }
   0xd   : > { %p3111_p7 = scmp.ge.s32.totalorder %s3685_s16, 1  ;;  %p322_p8 = scmp.lt.s32.totalorder %s3685_s16, 3 }
   0xf   : > { %p323_p9 = pnand %p3111_p7, %p322_p8 }
  0x10   : > { %p362_p10 = scmp.lt.s32.totalorder (!%p323_p9), %s3775_s17, 1  ;;  %s4405_s0 = sld [smem:[#allocation5_spill]] (!%p323_p9) }
  0x11   : > { %326 = sbr.rel (%p323_p9) target bundleno = 2748 (0xabc), region = 60  ;;  %s3689_s30 = smov (!%p323_p9), 8  }
  0x12   : > { %s3690_s11 = smov (!%p323_p9), 112   ;;  %s3691_s20 = smov (!%p323_p9), 1  }
  0x13   : > { %s3692_s21 = smov (!%p323_p9), 2   ;;  %s3693_s25 = smov (!%p323_p9), 113  }
  0x14   : > { %s3694_s26 = smov (!%p323_p9), 4   ;;  %s3696_s28 = smov (!%p323_p9), 119  }
  0x15   : > { %s4408_s1 = sld [smem:[#allocation6_spill]] (!%p323_p9)  ;;  %s359_s29 = sand.u32 (!%p323_p9), 1, %s3677_s14  }
  0x16   : > { %v373_v0 = vld [vmem:[%s4393_s3 + $0x18] sm:$0xff]  ;;  %v3687_v2 = vmov 0.0   ;;  %v372_v3 = vld [vmem:[%s4393_s3 + $0x10] sm:$0xff]  ;;  %s3818_s18 = scalar_select %p362_p10, %s3775_s17, 1  ;;  %v371_v5 = vld [vmem:[%s4393_s3 + $0x8] sm:$0xff]  ;;  %vm386_vm0 = vcmask 261120  }
  0x17   : > { %v377_v1 = vld [vmem:[%s4393_s3 + $0x38] sm:$0xff]  ;;  %3312 = vmatprep.subr.mxu0 %v3687_v2  ;;  %3323 = vmatprep.subr.mxu1 %v3687_v2  ;;  %v376_v4 = vld [vmem:[%s4393_s3 + $0x30] sm:$0xff]  ;;  %v375_v6 = vld [vmem:[%s4393_s3 + $0x28] sm:$0xff]  ;;  %vm3688_vm1 = vmmov 0   ;;  %vm1333_vm2 = vcmask 64512   ;;  %vm1650_vm3 = vcmask 1046528  }
  0x18   : > { %3313 = vmatpush3.msra.mxu0 %v373_v0  ;;  %3324 = vmatpush3.msra.mxu1 %v377_v1  ;;  %s3113_s27 = sshll.u32 %s3818_s18, 3  ;;  %v370_v7 = vld [vmem:[%s4393_s3] sm:$0xff]  ;;  %v381_v10 = vld [vmem:[%s4393_s3 + $0x58] sm:$0xff]  ;;  %v380_v12 = vld [vmem:[%s4393_s3 + $0x50] sm:$0xff]  ;;  %vm1671_vm4 = vcmask 130048   ;;  %vm1707_vm5 = vcmask 7168  }
  0x19   : > { %3314 = vmatprep.subr.mxu0 %v3687_v2  ;;  %3325 = vmatprep.subr.mxu1 %v3687_v2  ;;  %s3837_s12 = scalar_lea.vmem %s4405_s0, %s3113_s27  ;;  %v374_v8 = vld [vmem:[%s4393_s3 + $0x20] sm:$0xff]  ;;  %v385_v11 = vld [vmem:[%s4393_s3 + $0x78] sm:$0xff]  ;;  %v384_v13 = vld [vmem:[%s4393_s3 + $0x70] sm:$0xff]  ;;  %vm1748_vm7 = vcmask 15360   ;;  %s3695_s27 = smov 115   ;;  %vm1790_vm9 = vcmask 31744  }
  0x1a   : > { %3315 = vmatpush3.msra.mxu0 %v372_v3  ;;  %3326 = vmatpush3.msra.mxu1 %v376_v4  ;;  %v3843_v9 = vld [vmem:[%s3837_s12] sm:$0xff]  ;;  %v379_v14 = vld [vmem:[%s4393_s3 + $0x48] sm:$0xff]  ;;  %v3121_v18 = vld [vmem:[%s4393_s3 + $0x98] sm:$0xff]  ;;  %vm2927_vm14 = vcmask 523264  }
  0x1b   : > { %3316 = vmatprep.subr.mxu0 %v3687_v2  ;;  %3327 = vmatprep.subr.mxu1 %v3687_v2  ;;  %v383_v15 = vld [vmem:[%s4393_s3 + $0x68] sm:$0xff]  ;;  %v378_v16 = vld [vmem:[%s4393_s3 + $0x40] sm:$0xff]  ;;  %v3125_v19 = vld [vmem:[%s4393_s3 + $0xb8] sm:$0xff] }
  0x1c   : > { %3317 = vmatpush3.msra.mxu0 %v371_v5  ;;  %3328 = vmatpush3.msra.mxu1 %v375_v6  ;;  %v382_v17 = vld [vmem:[%s4393_s3 + $0x60] sm:$0xff]  ;;  %v3120_v20 = vld [vmem:[%s4393_s3 + $0x90] sm:$0xff]  ;;  %v3119_v22 = vld [vmem:[%s4393_s3 + $0x88] sm:$0xff] }
  0x1d   : > { %3318 = vmatprep.subr.mxu0 %v3687_v2  ;;  %3329 = vmatprep.subr.mxu1 %v3687_v2  ;;  %v3124_v21 = vld [vmem:[%s4393_s3 + $0xb0] sm:$0xff]  ;;  %v3123_v23 = vld [vmem:[%s4393_s3 + $0xa8] sm:$0xff]  ;;  %v3118_v24 = vld [vmem:[%s4393_s3 + $0x80] sm:$0xff] }
  0x1e   : > { %3319 = vmatpush3.msra.mxu0 %v370_v7  ;;  %3320 = vmatprep.mubr.msk.f32.mxu0 %vm3688_vm1, %v3687_v2  ;;  %v3122_v25 = vld [vmem:[%s4393_s3 + $0xa0] sm:$0xff]  ;;  %v3129_v26 = vld [vmem:[%s4393_s3 + $0xd8] sm:$0xff]  ;;  %v3128_v28 = vld [vmem:[%s4393_s3 + $0xd0] sm:$0xff] }
  0x1f   : > { %3330 = vmatpush3.msra.mxu1 %v374_v8  ;;  %3321 = vmatmul.mubr.msk.f32.vlgmr.msra.gmra.mxu0 %vm386_vm0, %v3843_v9  ;;  %v3133_v27 = vld [vmem:[%s4393_s3 + $0xf8] sm:$0xff]  ;;  %v3132_v29 = vld [vmem:[%s4393_s3 + $0xf0] sm:$0xff]  ;;  %v3127_v30 = vld [vmem:[%s4393_s3 + $0xc8] sm:$0xff] }
  0x20   : > { %3331 = vmatprep.mubr.msk.f32.mxu1 %vm3688_vm1, %v3687_v2  ;;  %3334 = vmatprep.subr.mxu0 %v3687_v2  ;;  %v3131_v31 = vld [vmem:[%s4393_s3 + $0xe8] sm:$0xff]  ;;  %v3126_v32 = vld [vmem:[%s4393_s3 + $0xc0] sm:$0xff]  ;;  %v3141_v34 = vld [vmem:[%s4393_s3 + $0x118] sm:$0xff] }
  0x21   : > { %3345 = vmatprep.subr.mxu1 %v3687_v2  ;;  %3332 = vmatmul.mubr.msk.f32.vlgmr.msra.gmra.mxu1 %vm386_vm0, %v3843_v9  ;;  %v3130_v33 = vld [vmem:[%s4393_s3 + $0xe0] sm:$0xff]  ;;  %v3145_v35 = vld [vmem:[%s4393_s3 + $0x138] sm:$0xff]  ;;  %v3140_v36 = vld [vmem:[%s4393_s3 + $0x110] sm:$0xff] }
  0x22   : > { %3335 = vmatpush3.msra.mxu0 %v381_v10  ;;  %3346 = vmatpush3.msra.mxu1 %v385_v11  ;;  %v3144_v37 = vld [vmem:[%s4393_s3 + $0x130] sm:$0xff]  ;;  %v3139_v38 = vld [vmem:[%s4393_s3 + $0x108] sm:$0xff]  ;;  %v3138_v40 = vld [vmem:[%s4393_s3 + $0x100] sm:$0xff] }
  0x23   : > { %3336 = vmatprep.subr.mxu0 %v3687_v2  ;;  %3347 = vmatprep.subr.mxu1 %v3687_v2  ;;  %v3143_v39 = vld [vmem:[%s4393_s3 + $0x128] sm:$0xff]  ;;  %v3149_v41 = vld [vmem:[%s4393_s3 + $0x158] sm:$0xff]  ;;  %v3148_v42 = vld [vmem:[%s4393_s3 + $0x150] sm:$0xff] }
  0x24   : > { %3337 = vmatpush3.msra.mxu0 %v380_v12  ;;  %3348 = vmatpush3.msra.mxu1 %v384_v13  ;;  %v3147_v43 = vld [vmem:[%s4393_s3 + $0x148] sm:$0xff]  ;;  %v3146_v44 = vld [vmem:[%s4393_s3 + $0x140] sm:$0xff]  ;;  %v3153_v47 = vld [vmem:[%s4393_s3 + $0x178] sm:$0xff] }
  0x25   : > { %3338 = vmatprep.subr.mxu0 %v3687_v2  ;;  %3349 = vmatprep.subr.mxu1 %v3687_v2  ;;  %v1329_v45 = vld [vmem:[%s4392_s2] sm:$0xff]  ;;  %v3152_v48 = vld [vmem:[%s4393_s3 + $0x170] sm:$0xff]  ;;  %v3151_v49 = vld [vmem:[%s4393_s3 + $0x168] sm:$0xff] }
  0x26   : > { %3339 = vmatpush3.msra.mxu0 %v379_v14  ;;  %3350 = vmatpush3.msra.mxu1 %v383_v15  ;;  %v3142_v46 = vld [vmem:[%s4393_s3 + $0x120] sm:$0xff]  ;;  %v1332_v51 = vld [vmem:[%s4392_s2 + $0x18] sm:$0xff]  ;;  %v1330_v56 = vld [vmem:[%s4392_s2 + $0x8] sm:$0xff] }
  0x27   : > { %3340 = vmatprep.subr.mxu0 %v3687_v2  ;;  %3351 = vmatprep.subr.mxu1 %v3687_v2  ;;  %v3150_v50 = vld [vmem:[%s4393_s3 + $0x160] sm:$0xff]  ;;  %v1331_v61 = vld [vmem:[%s4392_s2 + $0x10] sm:$0xff] }
  0x28   : > { %3341 = vmatpush3.msra.mxu0 %v378_v16  ;;  %3342 = vmatprep.mubr.msk.f32.mxu0 %vm3688_vm1, %v3687_v2  ;;  %v3166_v52 = vld [vmem:[%s4395_s5 + $0x4] ss:$0 sm:$0xff]  ;;  %v3167_v54 = vld [vmem:[%s4395_s5 + $0x5] ss:$0 sm:$0xff]  ;;  %v3168_v62 = vld [vmem:[%s4395_s5 + $0x6] ss:$0 sm:$0xff] }
  0x29   : > { %3352 = vmatpush3.msra.mxu1 %v382_v17  ;;  %3343 = vmatmul.mubr.msk.f32.vlgmr.msra.gmra.mxu0 %vm386_vm0, %v3843_v9  ;;  %v3169_v0 = vld [vmem:[%s4395_s5 + $0x7] ss:$0 sm:$0xff]  ;;  %v3158_v7 = vld [vmem:[%s4395_s5] ss:$0 sm:$0xff]  ;;  %v3159_v8 = vld [vmem:[%s4395_s5 + $0x1] ss:$0 sm:$0xff] }
  0x2a   : > { %3353 = vmatprep.mubr.msk.f32.mxu1 %vm3688_vm1, %v3687_v2  ;;  %3356 = vmatprep.subr.mxu0 %v3687_v2  ;;  %v3160_v15 = vld [vmem:[%s4395_s5 + $0x2] ss:$0 sm:$0xff]  ;;  %v3161_v16 = vld [vmem:[%s4395_s5 + $0x3] ss:$0 sm:$0xff] }
  0x2b   : > { %3367 = vmatprep.subr.mxu1 %v3687_v2  ;;  %3354 = vmatmul.mubr.msk.f32.vlgmr.msra.gmra.mxu1 %vm386_vm0, %v3843_v9 }
  0x2c   : > { %3357 = vmatpush3.msra.mxu0 %v3121_v18  ;;  %3368 = vmatpush3.msra.mxu1 %v3125_v19 }
  0x2d   : > { %3358 = vmatprep.subr.mxu0 %v3687_v2  ;;  %3369 = vmatprep.subr.mxu1 %v3687_v2 }
  0x2e   : > { %3359 = vmatpush3.msra.mxu0 %v3120_v20  ;;  %3370 = vmatpush3.msra.mxu1 %v3124_v21 }
  0x2f   : > { %3360 = vmatprep.subr.mxu0 %v3687_v2  ;;  %3371 = vmatprep.subr.mxu1 %v3687_v2 }
  0x30   : > { %3361 = vmatpush3.msra.mxu0 %v3119_v22  ;;  %3372 = vmatpush3.msra.mxu1 %v3123_v23 }
  0x31   : > { %3362 = vmatprep.subr.mxu0 %v3687_v2  ;;  %3373 = vmatprep.subr.mxu1 %v3687_v2 }
  0x32   : > { %3363 = vmatpush3.msra.mxu0 %v3118_v24  ;;  %3364 = vmatprep.mubr.msk.f32.mxu0 %vm3688_vm1, %v3687_v2 }
  0x33   : > { %3374 = vmatpush3.msra.mxu1 %v3122_v25  ;;  %3375 = vmatprep.mubr.msk.f32.mxu1 %vm3688_vm1, %v3687_v2 }
  0x34   : > { %3365 = vmatmul.mubr.msk.f32.vlgmr.msra.gmra.mxu0 %vm386_vm0, %v3843_v9  ;;  %3376 = vmatmul.mubr.msk.f32.vlgmr.msra.gmra.mxu1 %vm386_vm0, %v3843_v9 }
  0x35   : > { %3378 = vmatprep.subr.mxu0 %v3687_v2  ;;  %3389 = vmatprep.subr.mxu1 %v3687_v2 }
  0x36   : > { %3379 = vmatpush3.msra.mxu0 %v3129_v26  ;;  %3390 = vmatpush3.msra.mxu1 %v3133_v27 }
  0x37   : > { %3380 = vmatprep.subr.mxu0 %v3687_v2  ;;  %3391 = vmatprep.subr.mxu1 %v3687_v2 }
  0x38   : > { %3381 = vmatpush3.msra.mxu0 %v3128_v28  ;;  %3392 = vmatpush3.msra.mxu1 %v3132_v29 }
  0x39   : > { %3382 = vmatprep.subr.mxu0 %v3687_v2  ;;  %3393 = vmatprep.subr.mxu1 %v3687_v2 }
  0x3a   : > { %3383 = vmatpush3.msra.mxu0 %v3127_v30  ;;  %3394 = vmatpush3.msra.mxu1 %v3131_v31 }
  0x3b   : > { %3384 = vmatprep.subr.mxu0 %v3687_v2  ;;  %3395 = vmatprep.subr.mxu1 %v3687_v2 }
  0x3c   : > { %3385 = vmatpush3.msra.mxu0 %v3126_v32  ;;  %3386 = vmatprep.mubr.msk.f32.mxu0 %vm3688_vm1, %v3687_v2 }
  0x3d   : > { %3396 = vmatpush3.msra.mxu1 %v3130_v33  ;;  %3397 = vmatprep.mubr.msk.f32.mxu1 %vm3688_vm1, %v3687_v2 }
  0x3e   : > { %3387 = vmatmul.mubr.msk.f32.vlgmr.msra.gmra.mxu0 %vm386_vm0, %v3843_v9  ;;  %3398 = vmatmul.mubr.msk.f32.vlgmr.msra.gmra.mxu1 %vm386_vm0, %v3843_v9 }
  0x3f   : > { %3400 = vmatprep.subr.mxu0 %v3687_v2  ;;  %3408 = vmatprep.mubr.msk.f32.mxu0 %vm3688_vm1, %v3687_v2 }
  0x40   : > { %3401 = vmatpush3.msra.mxu0 %v3141_v34  ;;  %3411 = vmatprep.subr.mxu1 %v3687_v2 }
  0x41   : > { %3402 = vmatprep.subr.mxu0 %v3687_v2  ;;  %3412 = vmatpush3.msra.mxu1 %v3145_v35 }
  0x42   : > { %3403 = vmatpush3.msra.mxu0 %v3140_v36  ;;  %3413 = vmatprep.subr.mxu1 %v3687_v2 }
  0x43   : > { %3404 = vmatprep.subr.mxu0 %v3687_v2  ;;  %3414 = vmatpush3.msra.mxu1 %v3144_v37 }
  0x44   : > { %3405 = vmatpush3.msra.mxu0 %v3139_v38  ;;  %3415 = vmatprep.subr.mxu1 %v3687_v2 }
  0x45   : > { %3406 = vmatprep.subr.mxu0 %v3687_v2  ;;  %3416 = vmatpush3.msra.mxu1 %v3143_v39 }
  0x46   : > { %3407 = vmatpush3.msra.mxu0 %v3138_v40  ;;  %3417 = vmatprep.subr.mxu1 %v3687_v2 }
  0x47   : > { %3409 = vmatmul.mubr.msk.f32.vlgmr.msra.gmra.mxu0 %vm386_vm0, %v3843_v9  ;;  %3422 = vmatprep.subr.mxu0 %v3687_v2 }
  0x48   : > { %3423 = vmatpush3.msra.mxu0 %v3149_v41  ;;  %3430 = vmatprep.mubr.msk.f32.mxu0 %vm3688_vm1, %v3687_v2 }
  0x49   : > { %3424 = vmatprep.subr.mxu0 %v3687_v2  ;;  %3419 = vmatprep.mubr.msk.f32.mxu1 %vm3688_vm1, %v3687_v2 }
  0x4a   : > { %3425 = vmatpush3.msra.mxu0 %v3148_v42  ;;  %3418 = vmatpush3.msra.mxu1 %v3142_v46 }
  0x4b   : > { %3426 = vmatprep.subr.mxu0 %v3687_v2  ;;  %3420 = vmatmul.mubr.msk.f32.vlgmr.msra.gmra.mxu1 %vm386_vm0, %v3843_v9 }
  0x4c   : > { %3427 = vmatpush3.msra.mxu0 %v3147_v43  ;;  %3433 = vmatprep.subr.mxu1 %v3687_v2 }
  0x4d   : > { %3428 = vmatprep.subr.mxu0 %v3687_v2  ;;  %3434 = vmatpush3.msra.mxu1 %v3153_v47 }
  0x4e   : > { %3429 = vmatpush3.msra.mxu0 %v3146_v44  ;;  %3441 = vmatprep.mubr.msk.f32.mxu1 %vm3688_vm1, %v3687_v2 }
  0x4f   : > { %3431 = vmatmul.mubr.msk.f32.vlgmr.msra.gmra.mxu0 %vm386_vm0, %v3843_v9  ;;  %3444 = vmatprep.subr.mxu0 %v3687_v2 }
  0x50   : > { %3445 = vmatpush3.xpose.msk.msra.mxu0 %vm1333_vm2, %v1329_v45  ;;  %3446 = vmatprep.mubr.msk.f32.mxu0 %vm3688_vm1, %v3687_v2 }
  0x51   : > { %3449 = vmatprep.subr.mxu0 %v3687_v2  ;;  %3435 = vmatprep.subr.mxu1 %v3687_v2 }
  0x52   : > { %3436 = vmatpush3.msra.mxu1 %v3152_v48 }
  0x53   : > { %3437 = vmatprep.subr.mxu1 %v3687_v2 }
  0x54   : > { %3438 = vmatpush3.msra.mxu1 %v3151_v49 }
  0x55   : > { %3439 = vmatprep.subr.mxu1 %v3687_v2 }
  0x56   : > { %3440 = vmatpush3.msra.mxu1 %v3150_v50 }
  0x57   : > { %3442 = vmatmul.mubr.msk.f32.vlgmr.msra.gmra.mxu1 %vm386_vm0, %v3843_v9  ;;  %3459 = vmatprep.subr.mxu1 %v3687_v2 }
  0x58   : > { %3460 = vmatpush3.xpose.msk.msra.mxu1 %vm1333_vm2, %v1332_v51  ;;  %3461 = vmatprep.mubr.msk.f32.mxu1 %vm3688_vm1, %v3687_v2 }
  0x59   : > { %3469 = vmatprep.subr.mxu1 %v3687_v2 }
  0xdf   : > { %v456_v53 = vpop.f32.mrf.mxu0 }
  0xe0   : > { %v1325_v55 = vadd.f32 %v3166_v52, %v456_v53  ;;  %v1292_v11 = vadd.f32 %v3158_v7, %v456_v53 }
  0xe1   : > { %v3322_v57 = vpop.f32.mrf.mxu0  ;;  %v526_v58 = vpop.f32.mrf.mxu1 }
  0xe2   : > { %v1326_v59 = vadd.f32 %v3167_v54, %v526_v58  ;;  %3447 = vmatmul.mubr.msk.f32.vlgmr.msra.gmra.mxu0 %vm1333_vm2, %v1325_v55  ;;  %v1293_v12 = vadd.f32 %v3159_v8, %v526_v58 }
  0xe3   : > { %3450 = vmatpush3.xpose.msk.msra.mxu0 %vm1333_vm2, %v1330_v56  ;;  %v3333_v60 = vpop.f32.mrf.mxu1  ;;  %3451 = vmatprep.mubr.msk.f32.mxu0 %vm3688_vm1, %v3687_v2 }
  0xe4   : > { %3454 = vmatprep.subr.mxu0 %v3687_v2 }
  0xe6   : > { %3452 = vmatmul.mubr.msk.f32.vlgmr.msra.gmra.mxu0 %vm1333_vm2, %v1326_v59 }
  0xe7   : > { %3455 = vmatpush3.xpose.msk.msra.mxu0 %vm1333_vm2, %v1331_v61  ;;  %3456 = vmatprep.mubr.msk.f32.mxu0 %vm3688_vm1, %v3687_v2 }
  0xe8   : > { %3464 = vmatprep.subr.mxu0 %v3687_v2 }
  0xe9   : > { %v596_v63 = vpop.f32.mrf.mxu0 }
  0xea   : > { %v1327_v1 = vadd.f32 %v3168_v62, %v596_v63  ;;  %v1294_v19 = vadd.f32 %v3160_v15, %v596_v63 }
  0xeb   : > { %v3344_v3 = vpop.f32.mrf.mxu0  ;;  %v666_v4 = vpop.f32.mrf.mxu1 }
  0xec   : > { %v1328_v5 = vadd.f32 %v3169_v0, %v666_v4  ;;  %3457 = vmatmul.mubr.msk.f32.vlgmr.msra.gmra.mxu0 %vm1333_vm2, %v1327_v1  ;;  %v1295_v20 = vadd.f32 %v3161_v16, %v666_v4  ;;  %v1676_v4 = vlaneseq }
  0xed   : > { %v3355_v6 = vpop.f32.mrf.mxu1  ;;  %3466 = vmatprep.mubr.msk.f32.mxu0 %vm3688_vm1, %v3687_v2 }
  0xee   : > { %3462 = vmatmul.mubr.msk.f32.vlgmr.msra.gmra.mxu1 %vm1333_vm2, %v1328_v5  ;;  %v4167_v5 = vshrl.u32 %v1676_v4, 7 }
  0xef   : > { %3471 = vmatprep.mubr.msk.f32.mxu1 %vm3688_vm1, %v3687_v2 }
  0xf0   : > { %v4170_v6 = vadd.s32 2, %v4167_v5 }
  0xf2   : > { %v1712_v7 = vand.u32 1, %v4170_v6  ;;  %v1836_v4 = vshra.s32 %v4170_v6, 3 }
  0xf4   : > { %v753_v9 = vpop.f32.mrf.mxu0  ;;  %v823_v10 = vpop.f32.mrf.mxu1  ;;  %vm4173_vm6 = vcmp.gt.s32.totalorder %v1712_v7, 0  ;;  %v1837_v8 = vand.u32 1, %v1836_v4 }
  0xf5   : > { %3465 = vmatpush3.xpose.msk.msra.mxu0 %vm1333_vm2, %v753_v9  ;;  %3470 = vmatpush3.xpose.msk.msra.mxu1 %vm1333_vm2, %v823_v10 }
  0xf6   : > { %v3366_v13 = vpop.f32.mrf.mxu0  ;;  %v3377_v14 = vpop.f32.mrf.mxu1  ;;  %3474 = vmatprep.subr.mxu0 %v3687_v2  ;;  %3479 = vmatprep.subr.mxu1 %v3687_v2  ;;  %vm1838_vm12 = vcmp.gt.s32.totalorder %v1837_v8, 0 }
  0xf8   : > { %3467 = vmatmul.mubr.msk.f32.vlgmr.msra.gmra.mxu0 %vm1333_vm2, %v1292_v11  ;;  %3472 = vmatmul.mubr.msk.f32.vlgmr.msra.gmra.mxu1 %vm1333_vm2, %v1293_v12 }
  0xf9   : > { %3476 = vmatprep.mubr.msk.f32.mxu0 %vm3688_vm1, %v3687_v2  ;;  %3481 = vmatprep.mubr.msk.f32.mxu1 %vm3688_vm1, %v3687_v2 }
  0xfe   : > { %v893_v17 = vpop.f32.mrf.mxu0  ;;  %v963_v18 = vpop.f32.mrf.mxu1 }
  0xff   : > { %3475 = vmatpush3.xpose.msk.msra.mxu0 %vm1333_vm2, %v893_v17  ;;  %3480 = vmatpush3.xpose.msk.msra.mxu1 %vm1333_vm2, %v963_v18 }
 0x100   : > { %v3388_v21 = vpop.f32.mrf.mxu0  ;;  %3484 = vmatprep.subr.mxu0 %v3687_v2  ;;  %v3399_v22 = vpop.f32.mrf.mxu1  ;;  %3489 = vmatprep.subr.mxu1 %v3687_v2 }
 0x102   : > { %3477 = vmatmul.mubr.msk.f32.vlgmr.msra.gmra.mxu0 %vm1333_vm2, %v1294_v19  ;;  %3482 = vmatmul.mubr.msk.f32.vlgmr.msra.gmra.mxu1 %vm1333_vm2, %v1295_v20 }
 0x103   : > { %3486 = vmatprep.mubr.msk.f32.mxu0 %vm3688_vm1, %v3687_v2  ;;  %3491 = vmatprep.mubr.msk.f32.mxu1 %vm3688_vm1, %v3687_v2 }
 0x107   : > { %v1050_v23 = vpop.f32.mrf.mxu0 }
 0x108   : > { %3485 = vmatpush3.msra.mxu0 %v1050_v23 }
 0x109   : > { %v3410_v24 = vpop.f32.mrf.mxu0  ;;  %3494 = vmatprep.subr.mxu0 %v3687_v2 }
 0x10b   : > { %v1120_v27 = vpop.f32.mrf.mxu1 }
 0x10c   : > { %3490 = vmatpush3.msra.mxu1 %v1120_v27 }
 0x10d   : > { %v3421_v28 = vpop.f32.mrf.mxu1  ;;  %3499 = vmatprep.subr.mxu1 %v3687_v2 }
 0x10f   : > { %v4138_v25 = vpop.f32.mrf.mxu0 }
 0x111   : > { %v3432_v26 = vpop.f32.mrf.mxu0 }
 0x112   : > { %v1753_v26 = vshra.s32 %v4170_v6, 1 }
 0x114   : > { %v1754_v27 = vand.u32 1, %v1753_v26 }
 0x116   : > { %vm1755_vm8 = vcmp.gt.s32.totalorder %v1754_v27, 0 }
 0x117   : > { %v4141_v29 = vpop.f32.mrf.mxu1 }
 0x119   : > { %v3443_v30 = vpop.f32.mrf.mxu1 }
 0x1a2   : > { %v1406_v31 = vpop.f32.mrf.mxu0 }
 0x1a3   : > { %1655 = vrot.lane.b32.xlu0 %v1406_v31, %s3689_s30  ;;  %v1642_v47 = vrot.slane %v1406_v31, 1 }
 0x1a4   : > { %v3448_v32 = vpop.f32.mrf.mxu0 }
 0x1a5   : > { %v1651_v48 = vsel %vm1650_vm3, %v1642_v47, 0.0 }
 0x1a6   : > { %v1482_v33 = vpop.f32.mrf.mxu0 }
 0x1a7   : > { %1657 = vrot.lane.b32.xlu0 %v1482_v33, %s3689_s30  ;;  %v1643_v49 = vrot.slane %v1482_v33, 1 }
 0x1a8   : > { %v3453_v34 = vpop.f32.mrf.mxu0 }
 0x1a9   : > { %v1652_v53 = vsel %vm1650_vm3, %v1643_v49, 0.0  ;;  %v1795_v49 = vshra.s32 %v4170_v6, 2 }
 0x1ac   : > { %v1558_v35 = vpop.f32.mrf.mxu0 }
 0x1ad   : > { %1659 = vrot.lane.b32.xlu1 %v1558_v35, %s3689_s30  ;;  %v1644_v56 = vrot.slane %v1558_v35, 1 }
 0x1ae   : > { %v3458_v36 = vpop.f32.mrf.mxu0  ;;  %v1634_v37 = vpop.f32.mrf.mxu1 }
 0x1af   : > { %v1653_v58 = vsel %vm1650_vm3, %v1644_v56, 0.0  ;;  %v1645_v59 = vrot.slane %v1634_v37, 1 }
 0x1b0   : > { %v3463_v38 = vpop.f32.mrf.mxu1 }
 0x1b1   : > { %1661 = vrot.lane.b32.xlu1 %v1634_v37, %s3689_s30  ;;  %v1654_v63 = vsel %vm1650_vm3, %v1645_v59, 0.0 }
 0x1b8   : > { %v4147_v39 = vpop.f32.mrf.mxu0  ;;  %v4149_v40 = vpop.f32.mrf.mxu1 }
 0x1ba   : > { %v3468_v41 = vpop.f32.mrf.mxu0  ;;  %v3473_v42 = vpop.f32.mrf.mxu1 }
 0x1c2   : > { %v4151_v43 = vpop.f32.mrf.mxu0  ;;  %v4153_v44 = vpop.f32.mrf.mxu1 }
 0x1c4   : > { %v3478_v45 = vpop.f32.mrf.mxu0  ;;  %v3483_v46 = vpop.f32.mrf.mxu1 }
 0x215   : > { %v1656_v50 = vpop.permute.xlu0 %1655 }
 0x216   : > { %v1667_v51 = vsel %vm1333_vm2, %v1651_v48, %v1656_v50  ;;  %v1796_v50 = vand.u32 1, %v1795_v49 }
 0x217   : > { %v1672_v52 = vsel %vm1671_vm4, %v1667_v51, 0.0 }
 0x218   : > { %1683 = vrot.lane.b32.xlu0 %v1672_v52, %s3690_s11  ;;  %1695 = vrot.lane.b32.xlu1 %v1672_v52, %s3691_s20  ;;  %vm1797_vm10 = vcmp.gt.s32.totalorder %v1796_v50, 0 }
 0x219   : > { %v1658_v54 = vpop.permute.xlu0 %1657 }
 0x21a   : > { %v1668_v55 = vsel %vm1333_vm2, %v1652_v53, %v1658_v54 }
 0x21b   : > { %v1673_v57 = vsel %vm1671_vm4, %v1668_v55, 0.0 }
 0x21c   : > { %1685 = vrot.lane.b32.xlu0 %v1673_v57, %s3690_s11  ;;  %1697 = vrot.lane.b32.xlu1 %v1673_v57, %s3691_s20 }
 0x21f   : > { %v1660_v60 = vpop.permute.xlu1 %1659 }
 0x220   : > { %v1669_v61 = vsel %vm1333_vm2, %v1653_v58, %v1660_v60 }
 0x221   : > { %v1674_v62 = vsel %vm1671_vm4, %v1669_v61, 0.0 }
 0x222   : > { %1699 = vrot.lane.b32.xlu1 %v1674_v62, %s3691_s20  ;;  %1687 = vrot.lane.b32.xlu0 %v1674_v62, %s3690_s11 }
 0x223   : > { %v1662_v0 = vpop.permute.xlu1 %1661 }
 0x224   : > { %v1670_v1 = vsel %vm1333_vm2, %v1654_v63, %v1662_v0 }
 0x225   : > { %v1675_v3 = vsel %vm1671_vm4, %v1670_v1, 0.0 }
 0x226   : > { %1701 = vrot.lane.b32.xlu1 %v1675_v3, %s3691_s20  ;;  %1689 = vrot.lane.b32.xlu0 %v1675_v3, %s3690_s11  ;;  %s368_s20 = scalar_lea.vmem %s4408_s1, %s3818_s18  ;;  %s3112_s11 = sshll.u32 %s359_s29, 3 }
 0x227   : > { %v2153_v7 = vld [vmem:[%s368_s20] sm:$0x1]  ;;  %s3027_s1 = scalar_lea.sflag [#allocation3], %s359_s29  ;;  %s3698_s18 = smov [#allocation2]  }
 0x228   : > { %vm2154_vm11 = vcmp.gt.f32.partialorder %v2153_v7, 0.5 }
 0x28a   : > { %v1684_v9 = vpop.permute.xlu0 %1683  ;;  %v1696_v10 = vpop.permute.xlu1 %1695 }
 0x28b   : > { %v1708_v11 = vsel %vm1707_vm5, %v1684_v9, %v1696_v10  ;;  %v2158_v9 = vsub.s32 0, %v4167_v5  ;;  %v3697_v10 = vmov 0  }
 0x28c   : > { %v1716_v12 = vsel %vm4173_vm6, %v1708_v11, %v1672_v52  ;;  %v2155_v11 = vsel %vm2154_vm11, 1, %v3697_v10 }
 0x28d   : > { %1736 = vrot.lane.b32.xlu1 %v1716_v12, %s3692_s21  ;;  %1724 = vrot.lane.b32.xlu0 %v1716_v12, %s3693_s25 }
 0x28e   : > { %v1686_v13 = vpop.permute.xlu0 %1685  ;;  %v1698_v14 = vpop.permute.xlu1 %1697 }
 0x28f   : > { %v1709_v15 = vsel %vm1707_vm5, %v1686_v13, %v1698_v14  ;;  %v2159_v14 = vrot.slane %v2155_v11, %v2158_v9 }
 0x290   : > { %v1717_v16 = vsel %vm4173_vm6, %v1709_v15, %v1673_v57 }
 0x291   : > { %1738 = vrot.lane.b32.xlu1 %v1717_v16, %s3692_s21  ;;  %1726 = vrot.lane.b32.xlu0 %v1717_v16, %s3693_s25  ;;  %vm2160_vm13 = vcmp.eq.s32.totalorder %v2159_v14, 1 }
 0x294   : > { %v1700_v17 = vpop.permute.xlu1 %1699  ;;  %v1688_v18 = vpop.permute.xlu0 %1687 }
 0x295   : > { %v1710_v19 = vsel %vm1707_vm5, %v1688_v18, %v1700_v17 }
 0x296   : > { %v1718_v20 = vsel %vm4173_vm6, %v1710_v19, %v1674_v62 }
 0x297   : > { %1740 = vrot.lane.b32.xlu1 %v1718_v20, %s3692_s21  ;;  %1728 = vrot.lane.b32.xlu0 %v1718_v20, %s3693_s25 }
 0x298   : > { %v1702_v21 = vpop.permute.xlu1 %1701  ;;  %v1690_v22 = vpop.permute.xlu0 %1689 }
 0x299   : > { %v1711_v23 = vsel %vm1707_vm5, %v1690_v22, %v1702_v21 }
 0x29a   : > { %v1719_v24 = vsel %vm4173_vm6, %v1711_v23, %v1675_v3 }
 0x29b   : > { %1742 = vrot.lane.b32.xlu1 %v1719_v24, %s3692_s21  ;;  %1730 = vrot.lane.b32.xlu0 %v1719_v24, %s3693_s25  ;;  %s3203_s21 = sshll.u32 %s3775_s17, 7  ;;  %s361_s25 = scalar_lea.vmem [#allocation2], %s3112_s11 }
 0x29c   : > { %s3038_s0 = scalar_lea.hbm %s4400_s10, %s3203_s21 }
 0x2ff   : > { %v1737_v28 = vpop.permute.xlu1 %1736  ;;  %v1725_v30 = vpop.permute.xlu0 %1724 }
 0x300   : > { %v1749_v31 = vsel %vm1748_vm7, %v1725_v30, %v1737_v28 }
 0x301   : > { %v1758_v32 = vsel %vm1755_vm8, %v1749_v31, %v1716_v12 }
 0x302   : > { %1778 = vrot.lane.b32.xlu1 %v1758_v32, %s3694_s26  ;;  %1766 = vrot.lane.b32.xlu0 %v1758_v32, %s3695_s27 }
 0x303   : > { %v1739_v33 = vpop.permute.xlu1 %1738  ;;  %v1727_v34 = vpop.permute.xlu0 %1726 }
 0x304   : > { %v1750_v35 = vsel %vm1748_vm7, %v1727_v34, %v1739_v33 }
 0x305   : > { %v1759_v36 = vsel %vm1755_vm8, %v1750_v35, %v1717_v16 }
 0x306   : > { %1780 = vrot.lane.b32.xlu1 %v1759_v36, %s3694_s26  ;;  %1768 = vrot.lane.b32.xlu0 %v1759_v36, %s3695_s27 }
 0x309   : > { %v1741_v37 = vpop.permute.xlu1 %1740  ;;  %v1729_v38 = vpop.permute.xlu0 %1728 }
 0x30a   : > { %v1751_v41 = vsel %vm1748_vm7, %v1729_v38, %v1741_v37 }
 0x30b   : > { %v1760_v42 = vsel %vm1755_vm8, %v1751_v41, %v1718_v20 }
 0x30c   : > { %1782 = vrot.lane.b32.xlu1 %v1760_v42, %s3694_s26  ;;  %1770 = vrot.lane.b32.xlu0 %v1760_v42, %s3695_s27 }
 0x30d   : > { %v1743_v45 = vpop.permute.xlu1 %1742  ;;  %v1731_v46 = vpop.permute.xlu0 %1730 }
 0x30e   : > { %v1752_v47 = vsel %vm1748_vm7, %v1731_v46, %v1743_v45 }
 0x30f   : > { %v1761_v48 = vsel %vm1755_vm8, %v1752_v47, %v1719_v24 }
 0x310   : > { %1784 = vrot.lane.b32.xlu1 %v1761_v48, %s3694_s26  ;;  %1772 = vrot.lane.b32.xlu0 %v1761_v48, %s3695_s27  ;;  %s3040_s26 = sshll.u32 %s361_s25, 4  ;;  %s3041_s26 = int_to_ptr.vmem [resolvable:$true] %s3040_s26 }
 0x311   : > { %s3625_s20 = scalar_lea.vmem %s3041_s26, 128 }
 0x312   : > { %p3626_p11 = scmp.ne.s32.totalorder %s3041_s26, %s3625_s20 }
 0x314   : > { %p3627_p12 = pnand %p3626_p11, %p3792_p5 }
 0x316   : > { %p3628_p13 = pneg %p3627_p12 }
 0x374   : > { %v1779_v51 = vpop.permute.xlu1 %1778  ;;  %v1767_v52 = vpop.permute.xlu0 %1766 }
 0x375   : > { %v1791_v53 = vsel %vm1790_vm9, %v1767_v52, %v1779_v51 }
 0x376   : > { %v1800_v54 = vsel %vm1797_vm10, %v1791_v53, %v1758_v32 }
 0x377   : > { %1820 = vrot.lane.b32.xlu1 %v1800_v54, %s3689_s30  ;;  %1808 = vrot.lane.b32.xlu0 %v1800_v54, %s3696_s28 }
 0x378   : > { %v1781_v55 = vpop.permute.xlu1 %1780  ;;  %v1769_v56 = vpop.permute.xlu0 %1768 }
 0x379   : > { %v1792_v57 = vsel %vm1790_vm9, %v1769_v56, %v1781_v55 }
 0x37a   : > { %v1801_v58 = vsel %vm1797_vm10, %v1792_v57, %v1759_v36 }
 0x37b   : > { %1822 = vrot.lane.b32.xlu1 %v1801_v58, %s3689_s30  ;;  %1810 = vrot.lane.b32.xlu0 %v1801_v58, %s3696_s28 }
 0x37e   : > { %v1783_v59 = vpop.permute.xlu1 %1782  ;;  %v1771_v60 = vpop.permute.xlu0 %1770 }
 0x37f   : > { %v1793_v61 = vsel %vm1790_vm9, %v1771_v60, %v1783_v59 }
 0x380   : > { %v1802_v62 = vsel %vm1797_vm10, %v1793_v61, %v1760_v42 }
 0x381   : > { %1824 = vrot.lane.b32.xlu1 %v1802_v62, %s3689_s30  ;;  %1812 = vrot.lane.b32.xlu0 %v1802_v62, %s3696_s28 }
 0x382   : > { %v1785_v63 = vpop.permute.xlu1 %1784  ;;  %v1773_v0 = vpop.permute.xlu0 %1772 }
 0x383   : > { %v1794_v1 = vsel %vm1790_vm9, %v1773_v0, %v1785_v63 }
 0x384   : > { %v1803_v3 = vsel %vm1797_vm10, %v1794_v1, %v1761_v48 }
 0x385   : > { %1826 = vrot.lane.b32.xlu1 %v1803_v3, %s3689_s30  ;;  %1814 = vrot.lane.b32.xlu0 %v1803_v3, %s3696_s28  ;;  %s3629_s30 = sshll.u32 %s3698_s18, 4  ;;  %s3630_s30 = int_to_ptr.vmem [resolvable:$false] %s3629_s30 }
 0x386   : > { %s3631_s17 = scalar_lea.vmem %s3630_s30, 256  ;;  %p3632_p0 = scmp.lt.s32.totalorder %s3041_s26, %s3630_s30 }
 0x387   : > { %p3633_p1 = scmp.lt.s32.totalorder %s3631_s17, %s3625_s20 }
 0x389   : > { %p3634_p2 = por %p3633_p1, %p3632_p0 }
 0x38b   : > { %p3635_p3 = pnand %p3634_p2, %p3628_p13 }
 0x3e9   : > { %v1821_v12 = vpop.permute.xlu1 %1820  ;;  %v1809_v13 = vpop.permute.xlu0 %1808 }
 0x3ea   : > { %v1832_v15 = vsel %vm1333_vm2, %v1809_v13, %v1821_v12 }
 0x3eb   : > { %v1841_v16 = vsel %vm1838_vm12, %v1832_v15, %v1800_v54  ;;  %v2502_v15 = vld [vmem:[%s4394_s4 + $0x8] sm:$0xff] }
 0x3ec   : > { %v1918_v17 = vadd.f32 %v4147_v39, %v1841_v16  ;;  %v2503_v16 = vld [vmem:[%s4394_s4 + $0x10] sm:$0xff] }
 0x3ed   : > { %v1823_v18 = vpop.permute.xlu1 %1822  ;;  %v1811_v19 = vpop.permute.xlu0 %1810 }
 0x3ee   : > { %v1833_v6 = vsel %vm1333_vm2, %v1811_v19, %v1823_v18  ;;  %v2149_v20 = vmul.f32 0.35355338, %v1918_v17  ;;  %v2504_v19 = vld [vmem:[%s4394_s4 + $0x18] sm:$0xff] }
 0x3ef   : > { %v1842_v5 = vsel %vm1838_vm12, %v1833_v6, %v1801_v58 }
 0x3f0   : > { %v2161_v21 = vsel %vm2160_vm13, -1e+30, %v2149_v20  ;;  %v1994_v22 = vadd.f32 %v4149_v40, %v1842_v5 }
 0x3f1   : > { %v2165_v23 = vsel %vm1333_vm2, %v2161_v21, -inf }
 0x3f2   : > { %2166 = vmax.xlane.f32.xlu0 %v2165_v23  ;;  %v2150_v24 = vmul.f32 0.35355338, %v1994_v22 }
 0x3f3   : > { %v1825_v26 = vpop.permute.xlu1 %1824  ;;  %v1813_v27 = vpop.permute.xlu0 %1812 }
 0x3f4   : > { %v1834_v39 = vsel %vm1333_vm2, %v1813_v27, %v1825_v26  ;;  %v2162_v28 = vsel %vm2160_vm13, -1e+30, %v2150_v24 }
 0x3f5   : > { %v1843_v30 = vsel %vm1838_vm12, %v1834_v39, %v1802_v62  ;;  %v2168_v31 = vsel %vm1333_vm2, %v2162_v28, -inf }
 0x3f6   : > { %2169 = vmax.xlane.f32.xlu1 %v2168_v31  ;;  %v2070_v32 = vadd.f32 %v4151_v43, %v1843_v30 }
 0x3f7   : > { %v1827_v33 = vpop.permute.xlu1 %1826  ;;  %v1815_v34 = vpop.permute.xlu0 %1814 }
 0x3f8   : > { %v1835_v40 = vsel %vm1333_vm2, %v1815_v34, %v1827_v33  ;;  %v2151_v35 = vmul.f32 0.35355338, %v2070_v32 }
 0x3f9   : > { %v1844_v36 = vsel %vm1838_vm12, %v1835_v40, %v1803_v3 }
 0x3fa   : > { %v2163_v37 = vsel %vm2160_vm13, -1e+30, %v2151_v35  ;;  %v2146_v38 = vadd.f32 %v4153_v44, %v1844_v36  ;;  %v3624_v35 = vld [vmem:[%s3837_s12] sm:$0xff] }
 0x3fb   : > { %v2171_v41 = vsel %vm1333_vm2, %v2163_v37, -inf }
 0x3fc   : > { %2172 = vmax.xlane.f32.xlu0 %v2171_v41  ;;  %v2152_v42 = vmul.f32 0.35355338, %v2146_v38 }
 0x3fe   : > { %v2164_v45 = vsel %vm2160_vm13, -1e+30, %v2152_v42 }
 0x3ff   : > { %v2174_v46 = vsel %vm1333_vm2, %v2164_v45, -inf }
 0x400   : > { %2175 = vmax.xlane.f32.xlu0 %v2174_v46 }
 0x47b   : > { %v2167_v43 = vpop.xlane.xlu0 %2166 }
 0x47c   : > { %v2177_v47 = vsub.f32 %v2161_v21, %v2167_v43  ;;  %v2833_v43 = vld [vmem:[%s4397_s7 + $0x18] sm:$0xff] }
 0x47e   : > { %v2181_v48 = vmul.f32 1.442695, %v2177_v47  ;;  %v2832_v47 = vld [vmem:[%s4397_s7 + $0x10] sm:$0xff] }
 0x47f   : > { %v2170_v49 = vpop.xlane.xlu1 %2169 }
 0x480   : > { %3604 = vpow2.f32 %v2181_v48  ;;  %v2178_v50 = vsub.f32 %v2162_v28, %v2170_v49  ;;  %v2831_v48 = vld [vmem:[%s4397_s7 + $0x8] sm:$0xff]  ;;  %v2830_v49 = vld [vmem:[%s4397_s7] sm:$0xff] }
 0x482   : > { %v2183_v51 = vmul.f32 1.442695, %v2178_v50  ;;  %v2922_v50 = vld [vmem:[%s4399_s9 + $0x38] sm:$0xff] }
 0x484   : > { %3606 = vpow2.f32 %v2183_v51  ;;  %v2921_v51 = vld [vmem:[%s4399_s9 + $0x30] sm:$0xff] }
 0x485   : > { %v2173_v52 = vpop.xlane.xlu0 %2172 }
 0x486   : > { %v2179_v53 = vsub.f32 %v2163_v37, %v2173_v52  ;;  %v2920_v52 = vld [vmem:[%s4399_s9 + $0x28] sm:$0xff] }
 0x488   : > { %v2185_v44 = vmul.f32 1.442695, %v2179_v53  ;;  %v2919_v53 = vld [vmem:[%s4399_s9 + $0x20] sm:$0xff] }
 0x489   : > { %v2176_v54 = vpop.xlane.xlu0 %2175 }
 0x48a   : > { %3608 = vpow2.f32 %v2185_v44  ;;  %v2180_v55 = vsub.f32 %v2164_v45, %v2176_v54  ;;  %v2918_v44 = vld [vmem:[%s4399_s9 + $0x18] sm:$0xff] }
 0x48c   : > { %v2187_v56 = vmul.f32 1.442695, %v2180_v55 }
 0x48d   : > { %v3605_v57 = vpop.eup %3604 }
 0x48e   : > { %3610 = vpow2.f32 %v2187_v56  ;;  %v2189_v58 = vsel %vm1333_vm2, %v3605_v57, 0.0 }
 0x48f   : > { %2190 = vadd.xlane.f32.xlu1 %v2189_v58  ;;  %v3194_v58 = vld [vmem:[%s4396_s6] ss:$0 sm:$0xff] }
 0x491   : > { %v3607_v59 = vpop.eup %3606 }
 0x492   : > { %v2192_v60 = vsel %vm1333_vm2, %v3607_v59, 0.0 }
 0x493   : > { %2193 = vadd.xlane.f32.xlu0 %v2192_v60  ;;  %v3195_v60 = vld [vmem:[%s4396_s6 + $0x1] ss:$0 sm:$0xff] }
 0x497   : > { %v3609_v61 = vpop.eup %3608 }
 0x498   : > { %v2195_v62 = vsel %vm1333_vm2, %v3609_v61, 0.0 }
 0x499   : > { %2196 = vadd.xlane.f32.xlu1 %v2195_v62 }
 0x49b   : > { %v3611_v63 = vpop.eup %3610 }
 0x49c   : > { %v2198_v0 = vsel %vm1333_vm2, %v3611_v63, 0.0 }
 0x49d   : > { %2199 = vadd.xlane.f32.xlu0 %v2198_v0  ;;  %v2916_v0 = vld [vmem:[%s4399_s9 + $0x8] sm:$0xff] }
 0x518   : > { %v2191_v1 = vpop.xlane.xlu1 %2190 }
 0x519   : > { %3612 = vrcp.f32 %v2191_v1  ;;  %v2915_v1 = vld [vmem:[%s4399_s9] sm:$0xff] }
 0x51c   : > { %v2194_v3 = vpop.xlane.xlu0 %2193 }
 0x51d   : > { %3614 = vrcp.f32 %v2194_v3  ;;  %v3196_v3 = vld [vmem:[%s4398_s8] ss:$0 sm:$0xff] }
 0x522   : > { %v2197_v4 = vpop.xlane.xlu1 %2196 }
 0x523   : > { %3616 = vrcp.f32 %v2197_v4 }
 0x526   : > { %v3613_v7 = vpop.eup %3612  ;;  %v2200_v8 = vpop.xlane.xlu0 %2199 }
 0x527   : > { %3618 = vrcp.f32 %v2200_v8  ;;  %v2205_v9 = vmul.f32 %v3613_v7, %v3605_v57 }
 0x529   : > { %3487 = vmatmul.mubr.msk.f32.vlgmr.msra.gmra.mxu0 %vm1333_vm2, %v2205_v9 }
 0x52a   : > { %v3615_v10 = vpop.eup %3614  ;;  %3495 = vmatpush3.msra.mxu0 %v4138_v25  ;;  %3496 = vmatprep.mubr.msk.f32.mxu0 %vm3688_vm1, %v3687_v2 }
 0x52b   : > { %v2206_v11 = vmul.f32 %v3615_v10, %v3607_v59  ;;  %3504 = vmatprep.subr.mxu0 %v3687_v2  ;;  %v3198_v10 = vld [vmem:[%s4396_s6 + $0x4] ss:$0 sm:$0xff] }
 0x52d   : > { %3492 = vmatmul.mubr.msk.f32.vlgmr.msra.gmra.mxu1 %vm1333_vm2, %v2206_v11 }
 0x52e   : > { %3500 = vmatpush3.msra.mxu1 %v4141_v29  ;;  %3501 = vmatprep.mubr.msk.f32.mxu1 %vm3688_vm1, %v3687_v2  ;;  %v2501_v29 = vld [vmem:[%s4394_s4] sm:$0xff] }
 0x52f   : > { %3509 = vmatprep.subr.mxu1 %v3687_v2 }
 0x530   : > { %v3617_v12 = vpop.eup %3616 }
 0x531   : > { %v2207_v13 = vmul.f32 %v3617_v12, %v3609_v61 }
 0x533   : > { %3497 = vmatmul.mubr.msk.f32.vlgmr.msra.gmra.mxu0 %vm1333_vm2, %v2207_v13 }
 0x534   : > { %v3619_v25 = vpop.eup %3618  ;;  %3506 = vmatprep.mubr.msk.f32.mxu0 %vm3688_vm1, %v3687_v2  ;;  %3505 = vmatpush3.msra.mxu0 %v2501_v29 }
 0x535   : > { %v2208_v14 = vmul.f32 %v3619_v25, %v3611_v63  ;;  %3514 = vmatprep.subr.mxu0 %v3687_v2  ;;  %v2917_v63 = vld [vmem:[%s4399_s9 + $0x10] sm:$0xff] }
 0x537   : > { %3502 = vmatmul.mubr.msk.f32.vlgmr.msra.gmra.mxu1 %vm1333_vm2, %v2208_v14 }
 0x538   : > { %3511 = vmatprep.mubr.msk.f32.mxu1 %vm3688_vm1, %v3687_v2  ;;  %3510 = vmatpush3.msra.mxu1 %v2502_v15 }
 0x539   : > { %3519 = vmatprep.subr.mxu1 %v3687_v2 }
 0x5e9   : > { %v2278_v17 = vpop.f32.mrf.mxu0 }
 0x5ea   : > { %3507 = vmatmul.mubr.msk.f32.vlgmr.msra.gmra.mxu0 %vm1333_vm2, %v2278_v17 }
 0x5eb   : > { %v3488_v18 = vpop.f32.mrf.mxu0  ;;  %3515 = vmatpush3.msra.mxu0 %v2503_v16  ;;  %3516 = vmatprep.mubr.msk.f32.mxu0 %vm3688_vm1, %v3687_v2 }
 0x5ec   : > { %3524 = vmatprep.subr.mxu0 %v3687_v2 }
 0x5ed   : > { %v2351_v6 = vpop.f32.mrf.mxu1 }
 0x5ee   : > { %3512 = vmatmul.mubr.msk.f32.vlgmr.msra.gmra.mxu1 %vm1333_vm2, %v2351_v6 }
 0x5ef   : > { %v3493_v20 = vpop.f32.mrf.mxu1  ;;  %3520 = vmatpush3.msra.mxu1 %v2504_v19  ;;  %3521 = vmatprep.mubr.msk.f32.mxu1 %vm3688_vm1, %v3687_v2 }
 0x5f0   : > { %3535 = vmatprep.subr.mxu1 %v3687_v2 }
 0x5f3   : > { %v2424_v5 = vpop.f32.mrf.mxu0 }
 0x5f4   : > { %3517 = vmatmul.mubr.msk.f32.vlgmr.msra.gmra.mxu0 %vm1333_vm2, %v2424_v5  ;;  %v3200_v5 = vld [vmem:[%s4396_s6 + $0x2] ss:$0 sm:$0xff] }
 0x5f5   : > { %v3498_v21 = vpop.f32.mrf.mxu0  ;;  %3532 = vmatprep.mubr.msk.f32.mxu0 %vm3688_vm1, %v3687_v2  ;;  %3525 = vmatpush3.msra.mxu0 %v2833_v43 }
 0x5f6   : > { %3526 = vmatprep.subr.mxu0 %v3687_v2 }
 0x5f7   : > { %v2497_v22 = vpop.f32.mrf.mxu1  ;;  %3527 = vmatpush3.msra.mxu0 %v2832_v47 }
 0x5f8   : > { %3522 = vmatmul.mubr.msk.f32.vlgmr.msra.gmra.mxu1 %vm1333_vm2, %v2497_v22  ;;  %3528 = vmatprep.subr.mxu0 %v3687_v2  ;;  %v3201_v22 = vld [vmem:[%s4396_s6 + $0x3] ss:$0 sm:$0xff] }
 0x5f9   : > { %v3503_v23 = vpop.f32.mrf.mxu1  ;;  %3551 = vmatprep.mubr.msk.f32.mxu1 %vm3688_vm1, %v3687_v2  ;;  %3529 = vmatpush3.msra.mxu0 %v2831_v48 }
 0x5fa   : > { %3530 = vmatprep.subr.mxu0 %v3687_v2  ;;  %3536 = vmatpush3.msra.mxu1 %v2922_v50 }
 0x5fb   : > { %3531 = vmatpush3.msra.mxu0 %v2830_v49  ;;  %3537 = vmatprep.subr.mxu1 %v3687_v2 }
 0x5fc   : > { %3538 = vmatpush3.msra.mxu1 %v2921_v51 }
 0x5fd   : > { %3539 = vmatprep.subr.mxu1 %v3687_v2 }
 0x5fe   : > { %3540 = vmatpush3.msra.mxu1 %v2920_v52 }
 0x5ff   : > { %3541 = vmatprep.subr.mxu1 %v3687_v2 }
 0x600   : > { %3542 = vmatpush3.msra.mxu1 %v2919_v53 }
 0x601   : > { %3543 = vmatprep.subr.mxu1 %v3687_v2 }
 0x602   : > { %3544 = vmatpush3.msra.mxu1 %v2918_v44 }
 0x603   : > { %3545 = vmatprep.subr.mxu1 %v3687_v2 }
 0x604   : > { %3546 = vmatpush3.msra.mxu1 %v2917_v63 }
 0x605   : > { %3547 = vmatprep.subr.mxu1 %v3687_v2 }
 0x606   : > { %3548 = vmatpush3.msra.mxu1 %v2916_v0 }
 0x607   : > { %3549 = vmatprep.subr.mxu1 %v3687_v2 }
 0x608   : > { %3550 = vmatpush3.msra.mxu1 %v2915_v1 }
 0x6aa   : > { %v2574_v24 = vpop.f32.mrf.mxu0 }
 0x6ac   : > { %v3508_v26 = vpop.f32.mrf.mxu0 }
 0x6ae   : > { %v2647_v27 = vpop.f32.mrf.mxu1 }
 0x6af   : > { %v2797_v30 = vadd.f32 %v2647_v27, %v2574_v24 }
 0x6b0   : > { %v3513_v39 = vpop.f32.mrf.mxu1 }
 0x6b4   : > { %v2720_v28 = vpop.f32.mrf.mxu0 }
 0x6b5   : > { %v2798_v32 = vadd.f32 %v2797_v30, %v2720_v28 }
 0x6b6   : > { %v3518_v31 = vpop.f32.mrf.mxu0 }
 0x6b8   : > { %v2793_v33 = vpop.f32.mrf.mxu1 }
 0x6b9   : > { %v2799_v34 = vadd.f32 %v2798_v32, %v2793_v33 }
 0x6ba   : > { %v3523_v40 = vpop.f32.mrf.mxu1 }
 0x6bb   : > { %v2805_v36 = vadd.f32 %v3624_v35, %v2799_v34 }
 0x6bd   : > { %v2806_v37 = vsel %vm386_vm0, %v2805_v36, 0.0 }
 0x6be   : > { %2807 = vadd.xlane.f32.xlu1 %v2806_v37 }
 0x747   : > { %v2808_v38 = vpop.xlane.xlu1 %2807 }
 0x748   : > { %v2810_v41 = vmul.f32 0.03125, %v2808_v38 }
 0x74a   : > { %v2811_v42 = vsub.f32 %v2805_v36, %v2810_v41 }
 0x74c   : > { %v2812_v45 = vmul.f32 %v2811_v42, %v2811_v42 }
 0x74e   : > { %v2813_v46 = vsel %vm386_vm0, %v2812_v45, 0.0 }
 0x74f   : > { %2814 = vadd.xlane.f32.xlu0 %v2813_v46 }
 0x7d8   : > { %v2815_v54 = vpop.xlane.xlu0 %2814 }
 0x7d9   : > { %v2816_v55 = vmul.f32 0.03125, %v2815_v54 }
 0x7db   : > { %v2817_v56 = vadd.f32 1e-05, %v2816_v55 }
 0x7dd   : > { %3620 = vrsqrt.f32 %v2817_v56 }
 0x7ea   : > { %v3621_v57 = vpop.eup %3620 }
 0x7eb   : > { %v2819_v59 = vmul.f32 %v3621_v57, %v2811_v42 }
 0x7ed   : > { %v2824_v61 = vmul.f32 %v3194_v58, %v2819_v59 }
 0x7ef   : > { %v2829_v62 = vadd.f32 %v3195_v60, %v2824_v61 }
 0x7f1   : > { %3533 = vmatmul.mubr.msk.f32.vlgmr.msra.gmra.mxu0 %vm386_vm0, %v2829_v62 }
 0x8b1   : > { %v2910_v4 = vpop.f32.mrf.mxu0 }
 0x8b2   : > { %v2911_v7 = vadd.f32 %v3196_v3, %v2910_v4 }
 0x8b3   : > { %v3534_v8 = vpop.f32.mrf.mxu0 }
 0x8b4   : > { %v2914_v9 = vmax.f32 %v2911_v7, 0.0 }
 0x8b6   : > { %3552 = vmatmul.mubr.msk.f32.vlgmr.msra.gmra.mxu1 %vm2927_vm14, %v2914_v9 }
 0x976   : > { %v2997_v11 = vpop.f32.mrf.mxu1 }
 0x977   : > { %v2998_v12 = vadd.f32 %v3198_v10, %v2997_v11 }
 0x978   : > { %v3553_v13 = vpop.f32.mrf.mxu1 }
 0x979   : > { %v3001_v2 = vadd.f32 %v2998_v12, %v2829_v62 }
 0x97b   : > { %v3002_v25 = vsel %vm386_vm0, %v3001_v2, 0.0 }
 0x97c   : > { %3003 = vadd.xlane.f32.xlu1 %v3002_v25 }
 0xa05   : > { %v3004_v14 = vpop.xlane.xlu1 %3003 }
 0xa06   : > { %v3005_v29 = vmul.f32 0.03125, %v3004_v14 }
 0xa08   : > { %v3006_v15 = vsub.f32 %v3001_v2, %v3005_v29 }
 0xa0a   : > { %v3007_v16 = vmul.f32 %v3006_v15, %v3006_v15 }
 0xa0c   : > { %v3008_v17 = vsel %vm386_vm0, %v3007_v16, 0.0 }
 0xa0d   : > { %3009 = vadd.xlane.f32.xlu0 %v3008_v17 }
 0xa96   : > { %v3010_v18 = vpop.xlane.xlu0 %3009 }
 0xa97   : > { %v3011_v19 = vmul.f32 0.03125, %v3010_v18 }
 0xa99   : > { %v3012_v6 = vadd.f32 1e-05, %v3011_v19 }
 0xa9b   : > { %3622 = vrsqrt.f32 %v3012_v6 }
 0xaa8   : > { %v3623_v20 = vpop.eup %3622 }
 0xaa9   : > { %v3014_v21 = vmul.f32 %v3623_v20, %v3006_v15 }
 0xaab   : > { %v3019_v23 = vmul.f32 %v3200_v5, %v3014_v21 }
 0xaad   : > { %v3024_v24 = vadd.f32 %v3201_v22, %v3019_v23 }
 0xaaf   : > { %3025 = vst.msk [vmem:[%s361_s25] sm:$0xff] %vm386_vm0, %v3024_v24 }
 0xab0   : > { %3638 = shalt.err (!%p3635_p3)
}
 0xab1   : > { %s3639_s11 = scalar_lea.hbm %s3038_s0, 128  ;;  %s3643_s21 = scalar_lea.hbm %s4400_s10, 256 }
 0xab2   : > { %p3640_p4 = scmp.ne.s32.totalorder %s3038_s0, %s3639_s11  ;;  %p3644_p9 = scmp.lt.s32.totalorder %s3038_s0, %s4400_s10 }
 0xab3   : > { %p3645_p10 = scmp.lt.s32.totalorder %s3643_s21, %s3639_s11 }
 0xab4   : > { %p3641_p7 = pnand %p3640_p4, %p3792_p5 }
 0xab5   : > { %p3646_p11 = por %p3645_p10, %p3644_p9 }
 0xab6   : > { %p3642_p8 = pneg %p3641_p7 }
 0xab8   : > { %p3647_p12 = pnand %p3646_p11, %p3642_p8 }
 0xaba   : > { %3650 = shalt.err (!%p3647_p12)
}
 0xabb   : > { %3554 = dma.vmem_to_hbm [thread:$0]  (%p3792_p5), %s3041_s26, 128, %s3038_s0, %s3027_s1  }
 0xabc PF: > { %p3560_p13 = scmp.ge.s32.totalorder %s3685_s16, 2  ;;  %s3052_s28 = sand.u32 1, %s3673_s13  }
 0xabd   : > { %s3053_s20 = scalar_lea.sflag [#allocation3], %s3052_s28 }
 0xabe   : > { %p3557_p0 = pnand %p3560_p13, %p3796_p6 }
 0xac0   : > { %p3558_p1 = pneg %p3557_p0 }
 0xac2   : > { %3668 = dma.done.wait (%p3558_p1), %s3053_s20, 128  }
 0xac3   : > { %3670 = vsyncadd (%p3558_p1), %s3053_s20, 4294967168  ;;  %p20_p2 = scmp.ge.s32.totalorder %s3779_s19, 4   ;;  %s4409_s13 = smov %s3677_s14 }
 0xac4   : > { %s4410_s14 = smov %s3681_s15  ;;  %s4411_s15 = smov %s3790_s22 }
 0xac5   : > { %s4412_s16 = smov %s3779_s19  ;;  %22 = sbr.rel (!%p20_p2) target bundleno = 6 (0x6), region = 101 }
 0xaca   :  { %3058 = vsyncpa [#allocation3], 1 }
 0xacb   :  { %3060 = vsyncpa [#allocation3 + $0x1], 1 }

</bundles_post_ra>
